<compile_context>
chip_gen: v5e
topology: v5e:2x2
jax: 0.10.0
libtpu: 0.0.40
codegen_flags: <defaults>
</compile_context>

<pallas_src>
import functools
import math

import jax
import jax.numpy as jnp
from jax.experimental import pallas as pl
from jax.experimental.pallas import tpu as pltpu

EPS = 1e-5  # torch GroupNorm / LayerNorm default eps


def _gelu_exact(x):
    return 0.5 * x * (1.0 + jax.lax.erf(x * (1.0 / math.sqrt(2.0))))


def _ceil_to(x, m):
    return -(-x // m) * m


@functools.lru_cache(maxsize=1)
def _vmem_budget_bytes():
    """Generation-aware VMEM budget with headroom (v7x: 64 MiB phys -> ~40 MiB budget;
    v5e/v6e: 128 MiB -> ~80 MiB).  Conservative fallback if the query is unavailable."""
    try:
        info = pltpu.get_tpu_info()
        phys = int(getattr(info, "vmem_capacity_bytes", 64 * 2 ** 20))
    except Exception:  # pragma: no cover - defensive
        phys = 64 * 2 ** 20
    return int(phys * 0.62)


# --------------------------------------------------------------------------
# Shared conv compute: phase-decomposed strided Conv1d on one time tile.
# --------------------------------------------------------------------------
def _conv_acc(xb, wf, *, Tb, C_in, k, s):
    """xb: (Tb [+ halo], s*C_in) bf16 phase window; wf: (k*C_in, C_out) bf16.
    Returns f32 (Tb, C_out).  Q = ceil(k/s) contiguous chunk matmuls == exact conv FLOPs."""
    Q = -(-k // s)
    acc = None
    for q in range(Q):                       # static, tiny trip count (<= 2 for wav2vec2)
        ncols = min(s, k - q * s) * C_in     # trim the last chunk -> exact conv FLOPs
        r0 = q * s * C_in
        part = jnp.dot(xb[q:q + Tb, 0:ncols], wf[r0:r0 + ncols, :],
                       preferred_element_type=jnp.float32)
        acc = part if acc is None else acc + part
    return acc


def _window(x_ref, halo_ref):
    xb = x_ref[0].astype(jnp.bfloat16)       # no-op for bf16 inter-layer activations
    if halo_ref is not None:
        # sublane-aligned (Tb | 8) concat: appends the next tile's first phase rows.
        xb = jnp.concatenate([xb, halo_ref[0].astype(jnp.bfloat16)], axis=0)
    return xb


# --------------------------------------------------------------------------
# Kernel factories
# --------------------------------------------------------------------------
def _make_fused_kernel(*, Tb, C_in, C_out, k, s, norm, use_bias, has_halo, valid_rows):
    """Conv (+bias) (+GroupNorm[single-tile] / LayerNorm) + exact GELU, one tile."""

    def kernel(*refs):
        i = 0
        x_ref = refs[i]; i += 1
        h_ref = None
        if has_halo:
            h_ref = refs[i]; i += 1
        w_ref = refs[i]; i += 1
        b_ref = None
        if use_bias:
            b_ref = refs[i]; i += 1
        g_ref = bt_ref = None
        if norm is not None:
            g_ref, bt_ref = refs[i], refs[i + 1]; i += 2
        o_ref = refs[i]

        acc = _conv_acc(_window(x_ref, h_ref), w_ref[...], Tb=Tb, C_in=C_in, k=k, s=s)
        if use_bias:
            acc = acc + b_ref[...]

        if norm == "group":
            # Fp32GroupNorm(dim, dim): per-channel stats over the (valid) time rows.
            # Single-tile path only; one pass (sum / sum-of-squares), padded tail masked.
            if valid_rows < Tb:
                rid = jax.lax.broadcasted_iota(jnp.int32, (Tb, 1), 0)
                accv = jnp.where(rid < valid_rows, acc, 0.0)
            else:
                accv = acc
            inv_n = 1.0 / float(valid_rows)
            mu = jnp.sum(accv, axis=0, keepdims=True) * inv_n
            var = jnp.maximum(jnp.sum(accv * accv, axis=0, keepdims=True) * inv_n - mu * mu, 0.0)
            acc = (acc - mu) * jax.lax.rsqrt(var + EPS) * g_ref[...] + bt_ref[...]
        elif norm == "layer":
            # Fp32LayerNorm over channels, per time step (local to the tile).
            inv_c = 1.0 / float(C_out)
            mu = jnp.sum(acc, axis=-1, keepdims=True) * inv_c
            var = jnp.maximum(jnp.sum(acc * acc, axis=-1, keepdims=True) * inv_c - mu * mu, 0.0)
            acc = (acc - mu) * jax.lax.rsqrt(var + EPS) * g_ref[...] + bt_ref[...]

        o_ref[0] = _gelu_exact(acc).astype(o_ref.dtype)

    return kernel


def _make_conv_stats_kernel(*, Tb, C_in, k, s, use_bias, has_halo, valid_rows):
    """Pass 1 of the streaming GroupNorm: conv (+bias) per tile, bf16 raw output,
    per-channel sum / sum-of-squares accumulated across the time grid axis."""

    def kernel(*refs):
        i = 0
        x_ref = refs[i]; i += 1
        h_ref = None
        if has_halo:
            h_ref = refs[i]; i += 1
        w_ref = refs[i]; i += 1
        b_ref = None
        if use_bias:
            b_ref = refs[i]; i += 1
        raw_ref, st_ref = refs[i], refs[i + 1]

        t = pl.program_id(1)

        @pl.when(t == 0)
        def _():
            st_ref[...] = jnp.zeros_like(st_ref)

        acc = _conv_acc(_window(x_ref, h_ref), w_ref[...], Tb=Tb, C_in=C_in, k=k, s=s)
        if use_bias:
            acc = acc + b_ref[...]
        raw_ref[0] = acc.astype(raw_ref.dtype)

        # Exclude padded tail rows from the statistics.
        rid = jax.lax.broadcasted_iota(jnp.int32, (Tb, 1), 0)
        accv = jnp.where(t * Tb + rid < valid_rows, acc, 0.0)
        su = jnp.sum(accv, axis=0, keepdims=True)
        sq = jnp.sum(accv * accv, axis=0, keepdims=True)
        st_ref[0] = st_ref[0] + jnp.concatenate([su, sq], axis=0)

    return kernel


def _make_group_norm_gelu_kernel(*, valid_rows):
    """Pass 2 of the streaming GroupNorm: normalize + affine + exact GELU per tile."""
    inv_n = 1.0 / float(valid_rows)

    def kernel(raw_ref, st_ref, g_ref, bt_ref, o_ref):
        x = raw_ref[0].astype(jnp.float32)
        st = st_ref[0]                                     # (2, C_out) f32
        mu = st[0:1, :] * inv_n
        var = jnp.maximum(st[1:2, :] * inv_n - mu * mu, 0.0)
        y = (x - mu) * jax.lax.rsqrt(var + EPS) * g_ref[...] + bt_ref[...]
        o_ref[0] = _gelu_exact(y).astype(o_ref.dtype)

    return kernel


# --------------------------------------------------------------------------
# One conv block: Conv1d(stride) [+ bias] [+ GroupNorm/LayerNorm] + GELU
# --------------------------------------------------------------------------
def conv_block_apply(x, w, b, g, beta, *, k, s, norm, use_bias,
                     out_dtype=jnp.float32, tile_rows=None):
    """x: (B, T_in, C_in) f32/bf16 (time-major, channels in lanes).
    w: torch Conv1d layout (C_out, C_in, k).  Returns (B, T_out, C_out) in out_dtype."""
    B, T_in, C_in = x.shape
    C_out = w.shape[0]
    T_out = (T_in - k) // s + 1
    assert T_out > 0, "sequence too short for this conv layer"
    Q = -(-k // s)
    has_halo = Q > 1
    halo_rows = _ceil_to(Q - 1, 8) if has_halo else 0

    in_bytes = jnp.dtype(x.dtype).itemsize
    out_bytes = jnp.dtype(out_dtype).itemsize
    budget = _vmem_budget_bytes()

    # ---- time-tile size (conv-output rows per grid step), VMEM-bounded ---------------
    per_row = 2 * s * C_in * in_bytes + 2 * C_out * out_bytes + 3 * C_out * 4
    fixed = (2 * k * C_in * C_out * 2 + 2 * halo_rows * s * C_in * in_bytes
             + 8 * C_out * 4 + 2 * 2 ** 20)
    if tile_rows is None:
        cap = 1024 if budget > 60 * 2 ** 20 else 512     # v5e/v6e take bigger tiles than v7x
        Tb = min(_ceil_to(T_out, 8), cap)
        fit = max(8, ((budget - fixed) // max(per_row, 1)) // 8 * 8)
        Tb = max(8, min(Tb, fit))
    else:
        Tb = max(8, _ceil_to(int(tile_rows), 8))
        Tb = min(Tb, _ceil_to(T_out, 8))
    if has_halo:
        Tb = _ceil_to(Tb, halo_rows)                     # halo Blocked index stays integral
    n_t = -(-T_out // Tb)
    To_pad = n_t * Tb
    M_pad = To_pad + halo_rows

    # ---- phase layout: (B, T, C_in) -> (B, M_pad, s*C_in); free row-major reshape -----
    T_need = M_pad * s
    if T_need > T_in:                        # zero tail pad: never read by valid outputs
        x = jnp.pad(x, ((0, 0), (0, T_need - T_in), (0, 0)))
    elif T_need < T_in:
        x = x[:, :T_need, :]
    xp = x.reshape(B, M_pad, s * C_in)

    # Flatten taps: row (j*C_in + c) of w_flat is tap j, input channel c.  bf16 for the MXU.
    w_flat = jnp.transpose(w, (2, 1, 0)).reshape(k * C_in, C_out).astype(jnp.bfloat16)
    b2 = b.reshape(1, C_out).astype(jnp.float32)
    g2 = g.reshape(1, C_out).astype(jnp.float32)
    beta2 = beta.reshape(1, C_out).astype(jnp.float32)

    D = s * C_in
    main_spec = pl.BlockSpec((1, Tb, D), lambda bb, tt: (bb, tt, 0))
    halo_spec = (pl.BlockSpec((1, halo_rows, D),
                              lambda bb, tt: (bb, (tt + 1) * (Tb // halo_rows), 0))
                 if has_halo else None)
    w_spec = pl.BlockSpec((k * C_in, C_out), lambda bb, tt: (0, 0))       # fetched once
    vec_spec = pl.BlockSpec((1, C_out), lambda bb, tt: (0, 0))
    act_spec = pl.BlockSpec((1, Tb, C_out), lambda bb, tt: (bb, tt, 0))
    stats_spec = pl.BlockSpec((1, 2, C_out), lambda bb, tt: (bb, 0, 0))
    vmem_limit = int(budget)

    conv_specs = [main_spec] + ([halo_spec] if has_halo else []) + [w_spec]
    conv_args = [xp] + ([xp] if has_halo else []) + [w_flat]
    if use_bias:
        conv_specs.append(vec_spec)
        conv_args.append(b2)

    if norm == "group" and n_t > 1:
        # ------- streaming GroupNorm: two passes over the time grid axis --------------
        raw, stats = pl.pallas_call(
            _make_conv_stats_kernel(Tb=Tb, C_in=C_in, k=k, s=s, use_bias=use_bias,
                                    has_halo=has_halo, valid_rows=T_out),
            out_shape=(jax.ShapeDtypeStruct((B, To_pad, C_out), jnp.bfloat16),
                       jax.ShapeDtypeStruct((B, 2, C_out), jnp.float32)),
            grid_spec=pltpu.PrefetchScalarGridSpec(
                num_scalar_prefetch=0, grid=(B, n_t),
                in_specs=conv_specs,
                out_specs=[act_spec, stats_spec]),
            compiler_params=pltpu.CompilerParams(
                dimension_semantics=("parallel", "arbitrary"),   # stats accumulate over t
                vmem_limit_bytes=vmem_limit),
        )(*conv_args)

        y = pl.pallas_call(
            _make_group_norm_gelu_kernel(valid_rows=T_out),
            out_shape=jax.ShapeDtypeStruct((B, To_pad, C_out), out_dtype),
            grid_spec=pltpu.PrefetchScalarGridSpec(
                num_scalar_prefetch=0, grid=(B, n_t),
                in_specs=[act_spec, stats_spec, vec_spec, vec_spec],
                out_specs=act_spec),
            compiler_params=pltpu.CompilerParams(
                dimension_semantics=("parallel", "parallel"),
                vmem_limit_bytes=vmem_limit),
        )(raw, stats, g2, beta2)
    else:
        # ------- fused conv (+bias) (+norm) + GELU, one pallas_call -------------------
        specs = list(conv_specs)
        args = list(conv_args)
        if norm is not None:
            specs += [vec_spec, vec_spec]
            args += [g2, beta2]
        y = pl.pallas_call(
            _make_fused_kernel(Tb=Tb, C_in=C_in, C_out=C_out, k=k, s=s, norm=norm,
                               use_bias=use_bias, has_halo=has_halo, valid_rows=T_out),
            out_shape=jax.ShapeDtypeStruct((B, To_pad, C_out), out_dtype),
            grid_spec=pltpu.PrefetchScalarGridSpec(
                num_scalar_prefetch=0, grid=(B, n_t),
                in_specs=specs,
                out_specs=act_spec),
            compiler_params=pltpu.CompilerParams(
                dimension_semantics=("parallel", "parallel"),
                vmem_limit_bytes=vmem_limit),
        )(*args)

    if To_pad != T_out:
        y = y[:, :T_out, :]
    return y


# --------------------------------------------------------------------------
# Full ConvFeatureExtractionModel forward (eval mode)
# --------------------------------------------------------------------------
def conv_feature_extraction_forward(x, params, *, conv_layers, mode="default",
                                    conv_bias=False, tile_rows=None):
    """x: (B, T) raw waveform -> (B, C_last, T_final), matching the PyTorch NCW output."""
    assert mode in ("default", "layer_norm")
    B, T = x.shape
    h = x.reshape(B, T, 1).astype(jnp.float32)       # (B, T, C) layout: channels in lanes
    n = len(conv_layers)
    for i, (dim, k, s) in enumerate(conv_layers):
        p = params[i]
        norm = "layer" if mode == "layer_norm" else ("group" if i == 0 else None)
        out_dtype = jnp.float32 if i == n - 1 else jnp.bfloat16   # bf16 inter-layer acts
        h = conv_block_apply(h, p["w"], p["b"], p["g"], p["beta"],
                             k=k, s=s, norm=norm, use_bias=conv_bias,
                             out_dtype=out_dtype, tile_rows=tile_rows)
    # Final NCW permute is plain layout plumbing in the wrapper (kernel stores stay lane-dense).
    return jnp.transpose(h, (0, 2, 1))


# --------------------------------------------------------------------------
# Pure-JAX references (for correctness checks)
# --------------------------------------------------------------------------
def reference_forward(x, params, *, conv_layers, mode="default", conv_bias=False,
                      emulate_bf16=False):
    B, T = x.shape
    h = x.reshape(B, 1, T).astype(jnp.float32)      # NCW
    for i, (dim, k, s) in enumerate(conv_layers):
        p = params[i]
        if emulate_bf16:
            lhs, rhs, prec = h.astype(jnp.bfloat16), p["w"].astype(jnp.bfloat16), None
        else:
            lhs, rhs, prec = h, p["w"], jax.lax.Precision.HIGHEST
        y = jax.lax.conv_general_dilated(
            lhs, rhs, (s,), [(0, 0)],
            dimension_numbers=("NCH", "OIH", "NCH"),
            preferred_element_type=jnp.float32,
            precision=prec).astype(jnp.float32)
        if conv_bias:
            y = y + p["b"][None, :, None]
        if mode == "layer_norm":
            mu = jnp.mean(y, axis=1, keepdims=True)
            var = jnp.mean(jnp.square(y - mu), axis=1, keepdims=True)
            y = (y - mu) * jax.lax.rsqrt(var + EPS) * p["g"][None, :, None] + p["beta"][None, :, None]
        elif i == 0:  # default mode: GroupNorm(dim, dim) on the first layer only
            mu = jnp.mean(y, axis=2, keepdims=True)
            var = jnp.mean(jnp.square(y - mu), axis=2, keepdims=True)
            y = (y - mu) * jax.lax.rsqrt(var + EPS) * p["g"][None, :, None] + p["beta"][None, :, None]
        h = _gelu_exact(y)
    return h


# --------------------------------------------------------------------------
# Deterministic parameter init (shapes from the module __init__)
# --------------------------------------------------------------------------
def init_params(key, conv_layers):
    params = []
    in_d = 1
    keys = jax.random.split(key, 2 * len(conv_layers))
    for i, (dim, k, s) in enumerate(conv_layers):
        fan_in = in_d * k
        std = math.sqrt(2.0 / fan_in)               # kaiming_normal_
        bound = 1.0 / math.sqrt(fan_in)
        params.append({
            "w": std * jax.random.normal(keys[2 * i], (dim, in_d, k), jnp.float32),
            "b": jax.random.uniform(keys[2 * i + 1], (dim,), jnp.float32, -bound, bound),
            "g": jnp.ones((dim,), jnp.float32),
            "beta": jnp.zeros((dim,), jnp.float32),
        })
        in_d = dim
    return params


if __name__ == "__main__":
    # Small shapes consistent with the module: raw waveform (B, T) -> conv stack.
    conv_layers = [(16, 10, 5), (32, 3, 2), (32, 2, 2)]   # (dim, kernel, stride)
    B, T = 2, 256

    root = jax.random.PRNGKey(0)
    kx, kp = jax.random.split(root)
    x = jax.random.normal(kx, (B, T), jnp.float32)
    params = init_params(kp, conv_layers)

    T_final = T
    for (_, k, s) in conv_layers:
        T_final = (T_final - k) // s + 1

    for mode, conv_bias in (("default", False), ("layer_norm", True)):
        ref_bf16 = reference_forward(x, params, conv_layers=conv_layers, mode=mode,
                                     conv_bias=conv_bias, emulate_bf16=True)
        ref_f32 = reference_forward(x, params, conv_layers=conv_layers, mode=mode,
                                    conv_bias=conv_bias, emulate_bf16=False)

        # tile_rows=None  -> auto (single tile per batch at these small shapes)
        # tile_rows=16    -> force the time-tiled path (halo blocks + streaming GroupNorm)
        for tile_rows in (None, 16):
            fwd = jax.jit(functools.partial(
                conv_feature_extraction_forward,
                conv_layers=conv_layers, mode=mode, conv_bias=conv_bias,
                tile_rows=tile_rows))
            out = jax.block_until_ready(fwd(x, params))

            assert out.shape == (B, conv_layers[-1][0], T_final), out.shape

            # Tight check vs a reference using the same bf16-operand / f32-accumulate numerics.
            assert jnp.allclose(out, ref_bf16, atol=1e-2, rtol=1e-2), \
                f"mismatch vs bf16-emulating reference (mode={mode}, tile_rows={tile_rows})"
            # Looser check vs the full-f32 reference (bounds the bf16 quantization error).
            assert jnp.allclose(out, ref_f32, atol=5e-2, rtol=5e-2), \
                f"mismatch vs f32 reference (mode={mode}, tile_rows={tile_rows})"

    print("KERNEL_OK")
</pallas_src>

<mosaic_0001>
module attributes {stable_mosaic.version = 11 : i64} {
  func.func @kernel(%arg0: i32, %arg1: i32, %arg2: memref<1x56x5xf32, #tpu.memory_space<vmem>>, %arg3: memref<1x8x5xf32, #tpu.memory_space<vmem>>, %arg4: memref<10x16xbf16, #tpu.memory_space<vmem>>, %arg5: memref<1x16xf32, #tpu.memory_space<vmem>>, %arg6: memref<1x16xf32, #tpu.memory_space<vmem>>, %arg7: memref<1x56x16xbf16, #tpu.memory_space<vmem>>) attributes {dimension_semantics = [#tpu.dimension_semantics<parallel>, #tpu.dimension_semantics<parallel>], iteration_bounds = array<i64: 2, 1>, scalar_prefetch = 0 : i64, scratch_operands = 0 : i64, tpu.core_type = #tpu.core_type<tc>, window_params = [{transform_indices = @transform_0, window_bounds = array<i64: 1, 56, 5>}, {transform_indices = @transform_1, window_bounds = array<i64: 1, 8, 5>}, {pipeline_mode = #tpu.pipeline_mode<synchronous>, transform_indices = @transform_2, window_bounds = array<i64: 10, 16>}, {pipeline_mode = #tpu.pipeline_mode<synchronous>, transform_indices = @transform_3, window_bounds = array<i64: 1, 16>}, {pipeline_mode = #tpu.pipeline_mode<synchronous>, transform_indices = @transform_4, window_bounds = array<i64: 1, 16>}, {transform_indices = @transform_5, window_bounds = array<i64: 1, 56, 16>}]} {
    %c0 = arith.constant 0 : index
    %c0_0 = arith.constant 0 : index
    %c0_1 = arith.constant 0 : index
    %0 = vector.load %arg2[%c0, %c0_0, %c0_1] : memref<1x56x5xf32, #tpu.memory_space<vmem>>, vector<1x56x5xf32>
    %1 = vector.shape_cast %0 : vector<1x56x5xf32> to vector<56x5xf32>
    %2 = arith.truncf %1 : vector<56x5xf32> to vector<56x5xbf16>
    %c0_2 = arith.constant 0 : index
    %c0_3 = arith.constant 0 : index
    %c0_4 = arith.constant 0 : index
    %3 = vector.load %arg3[%c0_2, %c0_3, %c0_4] : memref<1x8x5xf32, #tpu.memory_space<vmem>>, vector<1x8x5xf32>
    %4 = vector.shape_cast %3 : vector<1x8x5xf32> to vector<8x5xf32>
    %5 = arith.truncf %4 : vector<8x5xf32> to vector<8x5xbf16>
    %6 = tpu.concatenate %2, %5 in 0 : vector<56x5xbf16>, vector<8x5xbf16> -> vector<64x5xbf16>
    %c0_5 = arith.constant 0 : index
    %c0_6 = arith.constant 0 : index
    %7 = vector.load %arg4[%c0_5, %c0_6] : memref<10x16xbf16, #tpu.memory_space<vmem>>, vector<10x16xbf16>
    %8 = vector.extract_strided_slice %6 {offsets = [0, 0], sizes = [56, 5], strides = [1, 1]} : vector<64x5xbf16> to vector<56x5xbf16>
    %9 = vector.extract_strided_slice %7 {offsets = [0, 0], sizes = [5, 16], strides = [1, 1]} : vector<10x16xbf16> to vector<5x16xbf16>
    %cst = arith.constant dense<0.000000e+00> : vector<56x16xf32>
    %10 = tpu.matmul %8, %9, %cst {dimension_numbers = #tpu.dot_dimension_numbers<[1], [0], [0], [1], [0, 0, 1, 1], [], []>} : vector<56x5xbf16>, vector<5x16xbf16>, vector<56x16xf32> -> vector<56x16xf32>
    %11 = vector.extract_strided_slice %6 {offsets = [1, 0], sizes = [56, 5], strides = [1, 1]} : vector<64x5xbf16> to vector<56x5xbf16>
    %12 = vector.extract_strided_slice %7 {offsets = [5, 0], sizes = [5, 16], strides = [1, 1]} : vector<10x16xbf16> to vector<5x16xbf16>
    %cst_7 = arith.constant dense<0.000000e+00> : vector<56x16xf32>
    %13 = tpu.matmul %11, %12, %cst_7 {dimension_numbers = #tpu.dot_dimension_numbers<[1], [0], [0], [1], [0, 0, 1, 1], [], []>} : vector<56x5xbf16>, vector<5x16xbf16>, vector<56x16xf32> -> vector<56x16xf32>
    %14 = arith.addf %10, %13 : vector<56x16xf32>
    %15 = tpu.iota {dimensions = array<i32: 0>} : vector<56x1xi32>
    %c50_i32 = arith.constant 50 : i32
    %16 = vector.broadcast %c50_i32 : i32 to vector<56x1xi32>
    %17 = arith.cmpi slt, %15, %16 : vector<56x1xi32>
    %cst_8 = arith.constant 0.000000e+00 : f32
    %18 = vector.shape_cast %17 : vector<56x1xi1> to vector<56x1xi1>
    %19 = vector.broadcast %18 : vector<56x1xi1> to vector<56x16xi1>
    %20 = vector.broadcast %cst_8 : f32 to vector<56x16xf32>
    %21 = arith.select %19, %14, %20 : vector<56x16xi1>, vector<56x16xf32>
    %cst_9 = arith.constant dense<0.000000e+00> : vector<16xf32>
    %22 = vector.multi_reduction <add>, %21, %cst_9 [0] : vector<56x16xf32> to vector<16xf32>
    %23 = vector.shape_cast %22 : vector<16xf32> to vector<1x16xf32>
    %cst_10 = arith.constant 2.000000e-02 : f32
    %24 = vector.broadcast %cst_10 : f32 to vector<1x16xf32>
    %25 = arith.mulf %23, %24 : vector<1x16xf32>
    %26 = arith.mulf %21, %21 : vector<56x16xf32>
    %cst_11 = arith.constant dense<0.000000e+00> : vector<16xf32>
    %27 = vector.multi_reduction <add>, %26, %cst_11 [0] : vector<56x16xf32> to vector<16xf32>
    %28 = vector.shape_cast %27 : vector<16xf32> to vector<1x16xf32>
    %cst_12 = arith.constant 2.000000e-02 : f32
    %29 = vector.broadcast %cst_12 : f32 to vector<1x16xf32>
    %30 = arith.mulf %28, %29 : vector<1x16xf32>
    %31 = arith.mulf %25, %25 : vector<1x16xf32>
    %32 = arith.subf %30, %31 : vector<1x16xf32>
    %cst_13 = arith.constant 0.000000e+00 : f32
    %33 = vector.broadcast %cst_13 : f32 to vector<1x16xf32>
    %34 = arith.maximumf %32, %33 : vector<1x16xf32>
    %35 = vector.broadcast %25 : vector<1x16xf32> to vector<56x16xf32>
    %36 = arith.subf %14, %35 : vector<56x16xf32>
    %cst_14 = arith.constant 9.99999974E-6 : f32
    %37 = vector.broadcast %cst_14 : f32 to vector<1x16xf32>
    %38 = arith.addf %34, %37 : vector<1x16xf32>
    %39 = math.rsqrt %38 : vector<1x16xf32>
    %40 = vector.broadcast %39 : vector<1x16xf32> to vector<56x16xf32>
    %41 = arith.mulf %36, %40 : vector<56x16xf32>
    %c0_15 = arith.constant 0 : index
    %c0_16 = arith.constant 0 : index
    %42 = vector.load %arg5[%c0_15, %c0_16] : memref<1x16xf32, #tpu.memory_space<vmem>>, vector<1x16xf32>
    %43 = vector.broadcast %42 : vector<1x16xf32> to vector<56x16xf32>
    %44 = arith.mulf %41, %43 : vector<56x16xf32>
    %c0_17 = arith.constant 0 : index
    %c0_18 = arith.constant 0 : index
    %45 = vector.load %arg6[%c0_17, %c0_18] : memref<1x16xf32, #tpu.memory_space<vmem>>, vector<1x16xf32>
    %46 = vector.broadcast %45 : vector<1x16xf32> to vector<56x16xf32>
    %47 = arith.addf %44, %46 : vector<56x16xf32>
    %cst_19 = arith.constant 5.000000e-01 : f32
    %48 = vector.broadcast %cst_19 : f32 to vector<56x16xf32>
    %49 = arith.mulf %48, %47 : vector<56x16xf32>
    %cst_20 = arith.constant 0.707106769 : f32
    %50 = vector.broadcast %cst_20 : f32 to vector<56x16xf32>
    %51 = arith.mulf %47, %50 : vector<56x16xf32>
    %52 = math.erf %51 : vector<56x16xf32>
    %cst_21 = arith.constant 1.000000e+00 : f32
    %53 = vector.broadcast %cst_21 : f32 to vector<56x16xf32>
    %54 = arith.addf %53, %52 : vector<56x16xf32>
    %55 = arith.mulf %49, %54 : vector<56x16xf32>
    %56 = arith.truncf %55 : vector<56x16xf32> to vector<56x16xbf16>
    %c0_22 = arith.constant 0 : index
    %c0_23 = arith.constant 0 : index
    %c0_24 = arith.constant 0 : index
    %57 = vector.load %arg7[%c0_22, %c0_23, %c0_24] : memref<1x56x16xbf16, #tpu.memory_space<vmem>>, vector<1x56x16xbf16>
    %58 = vector.shape_cast %57 : vector<1x56x16xbf16> to vector<56x16xbf16>
    %59 = vector.shape_cast %56 : vector<56x16xbf16> to vector<1x56x16xbf16>
    tpu.vector_store %arg7[%c0_22, %c0_23, %c0_24], %59 {strides = array<i32>} : memref<1x56x16xbf16, #tpu.memory_space<vmem>>, vector<1x56x16xbf16>,
    return
  }
  func.func @transform_0(%arg0: i32, %arg1: i32) -> (i32, i32, i32) {
    %c0_i32 = arith.constant 0 : i32
    %c0_i32_0 = arith.constant 0 : i32
    return %arg0, %arg1, %c0_i32 : i32, i32, i32
  }
  func.func @transform_1(%arg0: i32, %arg1: i32) -> (i32, i32, i32) {
    %c1_i32 = arith.constant 1 : i32
    %0 = arith.addi %arg1, %c1_i32 : i32
    %c7_i32 = arith.constant 7 : i32
    %1 = arith.muli %0, %c7_i32 : i32
    %c0_i32 = arith.constant 0 : i32
    %c0_i32_0 = arith.constant 0 : i32
    return %arg0, %1, %c0_i32 : i32, i32, i32
  }
  func.func @transform_2(%arg0: i32, %arg1: i32) -> (i32, i32) {
    %c0_i32 = arith.constant 0 : i32
    %c0_i32_0 = arith.constant 0 : i32
    %c0_i32_1 = arith.constant 0 : i32
    return %c0_i32, %c0_i32_0 : i32, i32
  }
  func.func @transform_3(%arg0: i32, %arg1: i32) -> (i32, i32) {
    %c0_i32 = arith.constant 0 : i32
    %c0_i32_0 = arith.constant 0 : i32
    %c0_i32_1 = arith.constant 0 : i32
    return %c0_i32, %c0_i32_0 : i32, i32
  }
  func.func @transform_4(%arg0: i32, %arg1: i32) -> (i32, i32) {
    %c0_i32 = arith.constant 0 : i32
    %c0_i32_0 = arith.constant 0 : i32
    %c0_i32_1 = arith.constant 0 : i32
    return %c0_i32, %c0_i32_0 : i32, i32
  }
  func.func @transform_5(%arg0: i32, %arg1: i32) -> (i32, i32, i32) {
    %c0_i32 = arith.constant 0 : i32
    %c0_i32_0 = arith.constant 0 : i32
    return %arg0, %arg1, %c0_i32 : i32, i32, i32
  }
}

module attributes {stable_mosaic.version = 11 : i64} {
  func.func @kernel(%arg0: i32, %arg1: i32, %arg2: memref<1x24x32xbf16, #tpu.memory_space<vmem>>, %arg3: memref<1x8x32xbf16, #tpu.memory_space<vmem>>, %arg4: memref<48x32xbf16, #tpu.memory_space<vmem>>, %arg5: memref<1x24x32xbf16, #tpu.memory_space<vmem>>) attributes {dimension_semantics = [#tpu.dimension_semantics<parallel>, #tpu.dimension_semantics<parallel>], iteration_bounds = array<i64: 2, 1>, scalar_prefetch = 0 : i64, scratch_operands = 0 : i64, tpu.core_type = #tpu.core_type<tc>, window_params = [{transform_indices = @transform_0, window_bounds = array<i64: 1, 24, 32>}, {transform_indices = @transform_1, window_bounds = array<i64: 1, 8, 32>}, {pipeline_mode = #tpu.pipeline_mode<synchronous>, transform_indices = @transform_2, window_bounds = array<i64: 48, 32>}, {transform_indices = @transform_3, window_bounds = array<i64: 1, 24, 32>}]} {
    %c0 = arith.constant 0 : index
    %c0_0 = arith.constant 0 : index
    %c0_1 = arith.constant 0 : index
    %0 = vector.load %arg2[%c0, %c0_0, %c0_1] : memref<1x24x32xbf16, #tpu.memory_space<vmem>>, vector<1x24x32xbf16>
    %1 = vector.shape_cast %0 : vector<1x24x32xbf16> to vector<24x32xbf16>
    %c0_2 = arith.constant 0 : index
    %c0_3 = arith.constant 0 : index
    %c0_4 = arith.constant 0 : index
    %2 = vector.load %arg3[%c0_2, %c0_3, %c0_4] : memref<1x8x32xbf16, #tpu.memory_space<vmem>>, vector<1x8x32xbf16>
    %3 = vector.shape_cast %2 : vector<1x8x32xbf16> to vector<8x32xbf16>
    %4 = tpu.concatenate %1, %3 in 0 : vector<24x32xbf16>, vector<8x32xbf16> -> vector<32x32xbf16>
    %c0_5 = arith.constant 0 : index
    %c0_6 = arith.constant 0 : index
    %5 = vector.load %arg4[%c0_5, %c0_6] : memref<48x32xbf16, #tpu.memory_space<vmem>>, vector<48x32xbf16>
    %6 = vector.extract_strided_slice %4 {offsets = [0, 0], sizes = [24, 32], strides = [1, 1]} : vector<32x32xbf16> to vector<24x32xbf16>
    %7 = vector.extract_strided_slice %5 {offsets = [0, 0], sizes = [32, 32], strides = [1, 1]} : vector<48x32xbf16> to vector<32x32xbf16>
    %cst = arith.constant dense<0.000000e+00> : vector<24x32xf32>
    %8 = tpu.matmul %6, %7, %cst {dimension_numbers = #tpu.dot_dimension_numbers<[1], [0], [0], [1], [0, 0, 1, 1], [], []>} : vector<24x32xbf16>, vector<32x32xbf16>, vector<24x32xf32> -> vector<24x32xf32>
    %9 = vector.extract_strided_slice %4 {offsets = [1, 0], sizes = [24, 16], strides = [1, 1]} : vector<32x32xbf16> to vector<24x16xbf16>
    %10 = vector.extract_strided_slice %5 {offsets = [32, 0], sizes = [16, 32], strides = [1, 1]} : vector<48x32xbf16> to vector<16x32xbf16>
    %cst_7 = arith.constant dense<0.000000e+00> : vector<24x32xf32>
    %11 = tpu.matmul %9, %10, %cst_7 {dimension_numbers = #tpu.dot_dimension_numbers<[1], [0], [0], [1], [0, 0, 1, 1], [], []>} : vector<24x16xbf16>, vector<16x32xbf16>, vector<24x32xf32> -> vector<24x32xf32>
    %12 = arith.addf %8, %11 : vector<24x32xf32>
    %cst_8 = arith.constant 5.000000e-01 : f32
    %13 = vector.broadcast %cst_8 : f32 to vector<24x32xf32>
    %14 = arith.mulf %13, %12 : vector<24x32xf32>
    %cst_9 = arith.constant 0.707106769 : f32
    %15 = vector.broadcast %cst_9 : f32 to vector<24x32xf32>
    %16 = arith.mulf %12, %15 : vector<24x32xf32>
    %17 = math.erf %16 : vector<24x32xf32>
    %cst_10 = arith.constant 1.000000e+00 : f32
    %18 = vector.broadcast %cst_10 : f32 to vector<24x32xf32>
    %19 = arith.addf %18, %17 : vector<24x32xf32>
    %20 = arith.mulf %14, %19 : vector<24x32xf32>
    %21 = arith.truncf %20 : vector<24x32xf32> to vector<24x32xbf16>
    %c0_11 = arith.constant 0 : index
    %c0_12 = arith.constant 0 : index
    %c0_13 = arith.constant 0 : index
    %22 = vector.load %arg5[%c0_11, %c0_12, %c0_13] : memref<1x24x32xbf16, #tpu.memory_space<vmem>>, vector<1x24x32xbf16>
    %23 = vector.shape_cast %22 : vector<1x24x32xbf16> to vector<24x32xbf16>
    %24 = vector.shape_cast %21 : vector<24x32xbf16> to vector<1x24x32xbf16>
    tpu.vector_store %arg5[%c0_11, %c0_12, %c0_13], %24 {strides = array<i32>} : memref<1x24x32xbf16, #tpu.memory_space<vmem>>, vector<1x24x32xbf16>,
    return
  }
  func.func @transform_0(%arg0: i32, %arg1: i32) -> (i32, i32, i32) {
    %c0_i32 = arith.constant 0 : i32
    %c0_i32_0 = arith.constant 0 : i32
    return %arg0, %arg1, %c0_i32 : i32, i32, i32
  }
  func.func @transform_1(%arg0: i32, %arg1: i32) -> (i32, i32, i32) {
    %c1_i32 = arith.constant 1 : i32
    %0 = arith.addi %arg1, %c1_i32 : i32
    %c3_i32 = arith.constant 3 : i32
    %1 = arith.muli %0, %c3_i32 : i32
    %c0_i32 = arith.constant 0 : i32
    %c0_i32_0 = arith.constant 0 : i32
    return %arg0, %1, %c0_i32 : i32, i32, i32
  }
  func.func @transform_2(%arg0: i32, %arg1: i32) -> (i32, i32) {
    %c0_i32 = arith.constant 0 : i32
    %c0_i32_0 = arith.constant 0 : i32
    %c0_i32_1 = arith.constant 0 : i32
    return %c0_i32, %c0_i32_0 : i32, i32
  }
  func.func @transform_3(%arg0: i32, %arg1: i32) -> (i32, i32, i32) {
    %c0_i32 = arith.constant 0 : i32
    %c0_i32_0 = arith.constant 0 : i32
    return %arg0, %arg1, %c0_i32 : i32, i32, i32
  }
}

module attributes {stable_mosaic.version = 11 : i64} {
  func.func @kernel(%arg0: i32, %arg1: i32, %arg2: memref<1x16x64xbf16, #tpu.memory_space<vmem>>, %arg3: memref<64x32xbf16, #tpu.memory_space<vmem>>, %arg4: memref<1x16x32xf32, #tpu.memory_space<vmem>>) attributes {dimension_semantics = [#tpu.dimension_semantics<parallel>, #tpu.dimension_semantics<parallel>], iteration_bounds = array<i64: 2, 1>, scalar_prefetch = 0 : i64, scratch_operands = 0 : i64, tpu.core_type = #tpu.core_type<tc>, window_params = [{transform_indices = @transform_0, window_bounds = array<i64: 1, 16, 64>}, {pipeline_mode = #tpu.pipeline_mode<synchronous>, transform_indices = @transform_1, window_bounds = array<i64: 64, 32>}, {transform_indices = @transform_2, window_bounds = array<i64: 1, 16, 32>}]} {
    %c0 = arith.constant 0 : index
    %c0_0 = arith.constant 0 : index
    %c0_1 = arith.constant 0 : index
    %0 = vector.load %arg2[%c0, %c0_0, %c0_1] : memref<1x16x64xbf16, #tpu.memory_space<vmem>>, vector<1x16x64xbf16>
    %1 = vector.shape_cast %0 : vector<1x16x64xbf16> to vector<16x64xbf16>
    %c0_2 = arith.constant 0 : index
    %c0_3 = arith.constant 0 : index
    %2 = vector.load %arg3[%c0_2, %c0_3] : memref<64x32xbf16, #tpu.memory_space<vmem>>, vector<64x32xbf16>
    %cst = arith.constant dense<0.000000e+00> : vector<16x32xf32>
    %3 = tpu.matmul %1, %2, %cst {dimension_numbers = #tpu.dot_dimension_numbers<[1], [0], [0], [1], [0, 0, 1, 1], [], []>} : vector<16x64xbf16>, vector<64x32xbf16>, vector<16x32xf32> -> vector<16x32xf32>
    %cst_4 = arith.constant 5.000000e-01 : f32
    %4 = vector.broadcast %cst_4 : f32 to vector<16x32xf32>
    %5 = arith.mulf %4, %3 : vector<16x32xf32>
    %cst_5 = arith.constant 0.707106769 : f32
    %6 = vector.broadcast %cst_5 : f32 to vector<16x32xf32>
    %7 = arith.mulf %3, %6 : vector<16x32xf32>
    %8 = math.erf %7 : vector<16x32xf32>
    %cst_6 = arith.constant 1.000000e+00 : f32
    %9 = vector.broadcast %cst_6 : f32 to vector<16x32xf32>
    %10 = arith.addf %9, %8 : vector<16x32xf32>
    %11 = arith.mulf %5, %10 : vector<16x32xf32>
    %c0_7 = arith.constant 0 : index
    %c0_8 = arith.constant 0 : index
    %c0_9 = arith.constant 0 : index
    %12 = vector.load %arg4[%c0_7, %c0_8, %c0_9] : memref<1x16x32xf32, #tpu.memory_space<vmem>>, vector<1x16x32xf32>
    %13 = vector.shape_cast %12 : vector<1x16x32xf32> to vector<16x32xf32>
    %14 = vector.shape_cast %11 : vector<16x32xf32> to vector<1x16x32xf32>
    tpu.vector_store %arg4[%c0_7, %c0_8, %c0_9], %14 {strides = array<i32>} : memref<1x16x32xf32, #tpu.memory_space<vmem>>, vector<1x16x32xf32>,
    return
  }
  func.func @transform_0(%arg0: i32, %arg1: i32) -> (i32, i32, i32) {
    %c0_i32 = arith.constant 0 : i32
    %c0_i32_0 = arith.constant 0 : i32
    return %arg0, %arg1, %c0_i32 : i32, i32, i32
  }
  func.func @transform_1(%arg0: i32, %arg1: i32) -> (i32, i32) {
    %c0_i32 = arith.constant 0 : i32
    %c0_i32_0 = arith.constant 0 : i32
    %c0_i32_1 = arith.constant 0 : i32
    return %c0_i32, %c0_i32_0 : i32, i32
  }
  func.func @transform_2(%arg0: i32, %arg1: i32) -> (i32, i32, i32) {
    %c0_i32 = arith.constant 0 : i32
    %c0_i32_0 = arith.constant 0 : i32
    return %arg0, %arg1, %c0_i32 : i32, i32, i32
  }
}

</mosaic_0001>

<bundles_post_ra>
// kernel: conv_feature_extraction_forward.4
= control target key start
LH: loop header
LB: loop body
LE: loop exit
PB: predicated region body
PF: predicated region fallthrough
CT: control target
= control target key end

     0   :  { %s747_s12 = smov 0   ;;  %s749_s13 = smov 0   ;;  %s852_s0 = inlined_call_operand.vmem [shape: bf16[2,32,32], index: 0, kind: input, shape index: {}, may-alias: {0,1}]   ;;  %s853_s1 = inlined_call_operand.vmem [shape: bf16[2,32,32], index: 1, kind: input, shape index: {}, may-alias: {0,1}]   ;;  %s854_s2 = inlined_call_operand.vmem [shape: bf16[48,32], index: 2, kind: input, shape index: {}]   ;;  %s855_s3 = inlined_call_operand.vmem [shape: bf16[2,24,32], index: 3, kind: output, shape index: {}]  }
   0x1   :  { %s751_s14 = smov 0  }
   0x2 LB: > { %s25_s15 = sadd.s32 1, %s721_s13  ;;  %p630_p0 = scmp.ge.s32.totalorder %s725_s14, 1  ;;  %s725_s14 = sphi %s751_s14, %s13_s14   ;;  %s721_s13 = sphi %s749_s13, %s857_s13   ;;  %s717_s12 = sphi %s747_s12, %s856_s12  }
   0x3   : > { %p27_p1 = scmp.ge.s32.totalorder %s25_s15, 2  ;;  %p189_p2 = scmp.lt.s32.totalorder %s725_s14, 3 }
   0x5   : > { %s859_s15 = smov (%p27_p1, %s25_s15), 0  ;;  %p190_p3 = pnand %p630_p0, %p189_p2 }
   0x6   : > { %p240_p4 = scmp.lt.s32.totalorder (!%p190_p3), %s717_s12, 1 }
   0x7   : > { %193 = sbr.rel (%p190_p3) target bundleno = 217 (0xd9), region = 32 }
   0xc   : > { %v666_v0 = vld [vmem:[%s854_s2 + $0x8] sm:$0xff]  ;;  %v667_v1 = vld [vmem:[%s854_s2 + $0x10] sm:$0xff]  ;;  %v665_v2 = vld [vmem:[%s854_s2] sm:$0xff]  ;;  %s861_s12 = smov (!%p240_p4, %s717_s12), 1  ;;  %vm359_vm0 = vcmask 261120   ;;  %vm291_vm1 = vcmask 1043456  }
   0xd   : > { %370 = vmatpush.bf16.msra.mxu1 %v666_v0  ;;  %670 = vmatpush.bf16.msra.mxu2 %v666_v0  ;;  %s661_s22 = sshll.u32 %s861_s12, 4  ;;  %vm301_vm2 = vsmask.f32 7424  ;;  %vm322_vm3 = vcmask 130048   ;;  %s672_s30 = smul.u32 12, %s861_s12  ;;  %vm517_vm10 = vcmask 257024  }
   0xe   : > { %336 = vmatpush.bf16.msra.mxu0 %v667_v1  ;;  %669 = vmatpush.bf16.msra.mxu3 %v667_v1  ;;  %s247_s25 = scalar_lea.vmem %s852_s0, %s661_s22  ;;  %s663_s26 = sadd.s32 12, %s661_s22 }
   0xf   : > { %v664_v3 = vld [vmem:[%s247_s25] sm:$0xff]  ;;  %s262_s29 = scalar_lea.vmem %s853_s1, %s663_s26  ;;  %v278_v4 = vld [vmem:[%s247_s25 + $0x8] sm:$0xf]  ;;  %s273_s6 = scalar_lea.vmem %s855_s3, %s672_s30 }
  0x10   : > { %v279_v5 = vld [vmem:[%s262_s29] sm:$0xf]  ;;  %v285_v6 = vunpack.c.l.b16 %v278_v4  ;;  %v305_v7 = vshll.u32 %v664_v3, 16  ;;  %v303_v10 = vshrl.u32 %v664_v3, 16 }
  0x11   : > { %371 = vmatpush.bf16.msra.mxu1 %v665_v2  ;;  %671 = vmatpush.bf16.msra.mxu2 %v665_v2  ;;  %v289_v8 = vunpack.c.l.b16 %v279_v5 }
  0x12   : > { %v287_v9 = vpack.c.b16 %v285_v6, %v285_v6  ;;  %v307_v12 = vrot.slane %v305_v7, 1 }
  0x13   : > { %v290_v11 = vpack.c.b16 %v289_v8, %v289_v8 }
  0x14   : > { %654 = vmatmul.msk.bf16.vlgmr.msra.gmra.mxu1 %vm359_vm0, %v664_v3  ;;  %v308_v16 = vor.u32 %v307_v12, %v303_v10 }
  0x15   : > { %v294_v13 = vsel %vm291_vm1, %v287_v9, %v290_v11 }
  0x16   : > { %v309_v14 = vshll.u32 %v294_v13, 16  ;;  %v313_v15 = vshrl.u32 %v294_v13, 16  ;;  %655 = vmatmul.msk.bf16.vlgmr.msra.gmra.mxu2 %vm359_vm0, %v294_v13 }
  0x18   : > { %v311_v17 = vrot.slane %v309_v14, 1 }
  0x1a   : > { %v312_v18 = vsel %vm301_vm2, %v308_v16, %v311_v17  ;;  %v315_v19 = vor.u32 %v313_v15, %v311_v17 }
  0x1b   : > { %644 = vmatmul.msk.bf16.vlgmr.msra.gmra.mxu0 %vm322_vm3, %v312_v18 }
  0x1c   : > { %645 = vmatmul.msk.bf16.vlgmr.msra.gmra.mxu3 %vm322_vm3, %v315_v19 }
  0x91   : > { %v373_v20 = vpop.f32.mrf.mxu1 }
  0x98   : > { %v338_v21 = vpop.f32.mrf.mxu0 }
  0x99   : > { %v785_v22 = vadd.f32 %v373_v20, %v338_v21  ;;  %v378_v23 = vpop.f32.mrf.mxu2  ;;  %v375_v28 = vpop.f32.mrf.mxu1 }
  0x9b   : > { %v788_v24 = vmul.f32 0.70710677, %v785_v22 }
  0x9d   : > { %v388_v25 = vmul.f32 %v788_v24, %v788_v24 }
  0x9f   : > { %v389_v26 = vmin.f32 %v388_v25, 16.0  ;;  %v343_v27 = vpop.f32.mrf.mxu3 }
  0xa0   : > { %v792_v29 = vadd.f32 %v378_v23, %v343_v27  ;;  %v340_v30 = vpop.f32.mrf.mxu0 }
  0xa1   : > { %v390_v31 = vmul.f32 2.1237322e-06, %v389_v26  ;;  %v401_v32 = vmul.f32 3.8918573e-05, %v389_v26  ;;  %v794_v33 = vadd.f32 %v375_v28, %v340_v30  ;;  %v380_v34 = vpop.f32.mrf.mxu2 }
  0xa2   : > { %v797_v35 = vmul.f32 0.70710677, %v792_v29 }
  0xa3   : > { %v391_v36 = vadd.f32 0.00028619796, %v390_v31  ;;  %v402_v37 = vadd.f32 0.001143296, %v401_v32  ;;  %v802_v39 = vmul.f32 0.70710677, %v794_v33 }
  0xa4   : > { %v468_v38 = vmul.f32 %v797_v35, %v797_v35 }
  0xa5   : > { %v392_v40 = vmul.f32 %v391_v36, %v389_v26  ;;  %v403_v41 = vmul.f32 %v402_v37, %v389_v26  ;;  %v428_v43 = vmul.f32 %v802_v39, %v802_v39 }
  0xa6   : > { %v804_v42 = vmin.f32 %v468_v38, 16.0 }
  0xa7   : > { %v393_v44 = vadd.f32 0.0036580483, %v392_v40  ;;  %v404_v45 = vadd.f32 0.014752088, %v403_v41  ;;  %v345_v46 = vpop.f32.mrf.mxu3  ;;  %v810_v49 = vmin.f32 %v428_v43, 16.0 }
  0xa8   : > { %v470_v47 = vmul.f32 2.1237322e-06, %v804_v42  ;;  %v481_v48 = vmul.f32 3.8918573e-05, %v804_v42 }
  0xa9   : > { %v405_v50 = vmul.f32 %v404_v45, %v389_v26  ;;  %v394_v51 = vmul.f32 %v393_v44, %v389_v26  ;;  %v430_v54 = vmul.f32 2.1237322e-06, %v810_v49  ;;  %v441_v56 = vmul.f32 3.8918573e-05, %v810_v49 }
  0xaa   : > { %v471_v52 = vadd.f32 0.00028619796, %v470_v47  ;;  %v482_v53 = vadd.f32 0.001143296, %v481_v48 }
  0xab   : > { %v406_v55 = vadd.f32 0.112945676, %v405_v50  ;;  %v431_v59 = vadd.f32 0.00028619796, %v430_v54  ;;  %v442_v61 = vadd.f32 0.001143296, %v441_v56 }
  0xac   : > { %v472_v57 = vmul.f32 %v471_v52, %v804_v42  ;;  %v483_v58 = vmul.f32 %v482_v53, %v804_v42  ;;  %v395_v62 = vadd.f32 0.05243302, %v394_v51 }
  0xad   : > { %v407_v60 = vmul.f32 %v406_v55, %v389_v26  ;;  %v443_v2 = vmul.f32 %v442_v61, %v810_v49  ;;  %v432_v4 = vmul.f32 %v431_v59, %v810_v49 }
  0xae   : > { %v484_v63 = vadd.f32 0.014752088, %v483_v58  ;;  %v473_v1 = vadd.f32 0.0036580483, %v472_v57  ;;  %v396_v7 = vmul.f32 %v395_v62, %v389_v26 }
  0xaf   : > { %v408_v0 = vadd.f32 0.4994258, %v407_v60  ;;  %v444_v6 = vadd.f32 0.014752088, %v443_v2  ;;  %v433_v13 = vadd.f32 0.0036580483, %v432_v4 }
  0xb0   : > { %v485_v3 = vmul.f32 %v484_v63, %v804_v42  ;;  %v474_v10 = vmul.f32 %v473_v1, %v804_v42  ;;  %v397_v14 = vadd.f32 0.18741608, %v396_v7 }
  0xb1   : > { %v409_v5 = vmul.f32 %v408_v0, %v389_v26  ;;  %v445_v11 = vmul.f32 %v444_v6, %v810_v49  ;;  %v434_v19 = vmul.f32 %v433_v13, %v810_v49 }
  0xb2   : > { %v486_v8 = vadd.f32 0.112945676, %v485_v3  ;;  %v475_v16 = vadd.f32 0.05243302, %v474_v10  ;;  %v398_v21 = vmul.f32 %v397_v14, %v389_v26 }
  0xb3   : > { %v410_v9 = vadd.f32 1.0, %v409_v5  ;;  %v446_v17 = vadd.f32 0.112945676, %v445_v11  ;;  %v435_v31 = vadd.f32 0.05243302, %v434_v19 }
  0xb4   : > { %v487_v12 = vmul.f32 %v486_v8, %v804_v42  ;;  %v476_v27 = vmul.f32 %v475_v16, %v804_v42  ;;  %v399_v32 = vadd.f32 1.1283791, %v398_v21 }
  0xb5   : > { %697 = vrcp.f32 %v410_v9  ;;  %v447_v20 = vmul.f32 %v446_v17, %v810_v49  ;;  %v420_v37 = vand.u32 2147483647, %v410_v9  ;;  %v422_v38 = vand.u32 2147483648, %v410_v9 }
  0xb6   : > { %v488_v15 = vadd.f32 0.4994258, %v487_v12  ;;  %v477_v40 = vadd.f32 0.18741608, %v476_v27  ;;  %v436_v43 = vmul.f32 %v435_v31, %v810_v49  ;;  %vm416_vm5 = vweird.f32 %v410_v9 }
  0xb7   : > { %v448_v28 = vadd.f32 0.4994258, %v447_v20  ;;  %v423_v46 = vor.u32 1.1754944e-38, %v422_v38  ;;  %v400_v50 = vmul.f32 %v399_v32, %v788_v24  ;;  %vm421_vm7 = vcmp.eq.f32.partialorder %v420_v37, 8.507059e+37 }
  0xb8   : > { %v489_v18 = vmul.f32 %v488_v15, %v804_v42  ;;  %v478_v47 = vmul.f32 %v477_v40, %v804_v42  ;;  %v437_v52 = vadd.f32 0.18741608, %v436_v43  ;;  %v382_v24 = vmul.f32 0.5, %v785_v22 }
  0xb9   : > { %v449_v36 = vmul.f32 %v448_v28, %v810_v49 }
  0xba   : > { %v490_v23 = vadd.f32 1.0, %v489_v18  ;;  %v479_v57 = vadd.f32 1.1283791, %v478_v47  ;;  %v438_v62 = vmul.f32 %v437_v52, %v810_v49 }
  0xbb   : > { %v698_v25 = vpop.eup %697  ;;  %v450_v26 = vadd.f32 1.0, %v449_v36 }
  0xbc   : > { %v412_v30 = vmul.f32 %v698_v25, %v410_v9  ;;  %699 = vrcp.f32 %v490_v23  ;;  %vm417_vm4 = vweird.f32 %v698_v25  ;;  %v502_v56 = vand.u32 2147483648, %v490_v23 }
  0xbd   : > { %701 = vrcp.f32 %v450_v26  ;;  %vm418_vm6 = vmor %vm416_vm5, %vm417_vm4  ;;  %v500_v59 = vand.u32 2147483647, %v490_v23  ;;  %vm496_vm9 = vweird.f32 %v490_v23  ;;  %v480_v2 = vmul.f32 %v479_v57, %v797_v35 }
  0xbe   : > { %v413_v34 = vsub.f32 1.0, %v412_v30  ;;  %v503_v1 = vor.u32 1.1754944e-38, %v502_v56  ;;  %v439_v7 = vadd.f32 1.1283791, %v438_v62  ;;  %v462_v8 = vand.u32 2147483648, %v450_v26 }
  0xbf   : > { %vm501_vm12 = vcmp.eq.f32.partialorder %v500_v59, 8.507059e+37  ;;  %v460_v22 = vand.u32 2147483647, %v450_v26  ;;  %vm456_vm14 = vweird.f32 %v450_v26  ;;  %v384_v35 = vmul.f32 0.5, %v792_v29 }
  0xc0   : > { %v414_v41 = vmul.f32 %v698_v25, %v413_v34  ;;  %v463_v13 = vor.u32 1.1754944e-38, %v462_v8  ;;  %v440_v15 = vmul.f32 %v439_v7, %v802_v39 }
  0xc1   : > { %vm461_vm0 = vcmp.eq.f32.partialorder %v460_v22, 8.507059e+37 }
  0xc2   : > { %v700_v44 = vpop.eup %699  ;;  %v415_v45 = vadd.f32 %v698_v25, %v414_v41 }
  0xc3   : > { %v492_v48 = vmul.f32 %v700_v44, %v490_v23  ;;  %vm497_vm8 = vweird.f32 %v700_v44  ;;  %v702_v60 = vpop.eup %701  ;;  %v383_v23 = vmul.f32 0.5, %v794_v33 }
  0xc4   : > { %v419_v51 = vsel %vm418_vm6, %v698_v25, %v415_v45  ;;  %v452_v63 = vmul.f32 %v702_v60, %v450_v26  ;;  %vm498_vm11 = vmor %vm496_vm9, %vm497_vm8  ;;  %vm457_vm13 = vweird.f32 %v702_v60 }
  0xc5   : > { %v424_v53 = vsel %vm421_vm7, %v423_v46, %v419_v51  ;;  %v493_v54 = vsub.f32 1.0, %v492_v48  ;;  %vm458_vm15 = vmor %vm456_vm14, %vm457_vm13 }
  0xc6   : > { %v425_v55 = vmul.f32 %v424_v53, %v400_v50  ;;  %v453_v4 = vsub.f32 1.0, %v452_v63 }
  0xc7   : > { %v494_v58 = vmul.f32 %v700_v44, %v493_v54 }
  0xc8   : > { %v656_v61 = vclamps-f32 %v425_v55, 1.0  ;;  %v454_v9 = vmul.f32 %v702_v60, %v453_v4 }
  0xc9   : > { %v495_v42 = vadd.f32 %v700_v44, %v494_v58 }
  0xca   : > { %v508_v0 = vadd.f32 1.0, %v656_v61  ;;  %v455_v12 = vadd.f32 %v702_v60, %v454_v9 }
  0xcb   : > { %v499_v3 = vsel %vm498_vm11, %v700_v44, %v495_v42 }
  0xcc   : > { %v511_v5 = vmul.f32 %v508_v0, %v382_v24  ;;  %v504_v6 = vsel %vm501_vm12, %v503_v1, %v499_v3  ;;  %v459_v16 = vsel %vm458_vm15, %v702_v60, %v455_v12 }
  0xcd   : > { %v505_v49 = vmul.f32 %v504_v6, %v480_v2  ;;  %v464_v17 = vsel %vm461_vm0, %v463_v13, %v459_v16 }
  0xce   : > { %v514_v10 = vpack.c.bf16 %v511_v5, %v511_v5  ;;  %v465_v19 = vmul.f32 %v464_v17, %v440_v15 }
  0xcf   : > { %v658_v11 = vclamps-f32 %v505_v49, 1.0 }
  0xd0   : > { %518 = vst.msk [vmem:[%s273_s6] sm:$0xf] %vm517_vm10, %v514_v10  ;;  %v657_v21 = vclamps-f32 %v465_v19, 1.0 }
  0xd1   : > { %v510_v14 = vadd.f32 1.0, %v658_v11 }
  0xd2   : > { %v509_v25 = vadd.f32 1.0, %v657_v21 }
  0xd3   : > { %v513_v18 = vmul.f32 %v510_v14, %v384_v35 }
  0xd4   : > { %v512_v27 = vmul.f32 %v509_v25, %v383_v23 }
  0xd5   : > { %v516_v20 = vpack.c.bf16 %v513_v18, %v513_v18 }
  0xd6   : > { %v515_v28 = vpack.c.bf16 %v512_v27, %v512_v27 }
  0xd7   : > { %520 = vst.msk [vmem:[%s273_s6 + $0x8] sm:$0xf] %vm517_vm10, %v516_v20 }
  0xd8   : > { %519 = vst.msk [vmem:[%s273_s6 + $0x4] sm:$0xf] %vm517_vm10, %v515_v28 }
  0xd9 PF: > { %s13_s14 = sadd.s32 1, %s725_s14   ;;  %s856_s12 = smov %s721_s13 }
  0xda   : > { %p10_p5 = scmp.ge.s32.totalorder %s13_s14, 4   ;;  %s857_s13 = smov %s859_s15 }
  0xdc   :  { %12 = sbr.rel (!%p10_p5) target bundleno = 2 (0x2), region = 65 }

// kernel: conv_feature_extraction_forward.5
= control target key start
LH: loop header
LB: loop body
LE: loop exit
PB: predicated region body
PF: predicated region fallthrough
CT: control target
= control target key end

     0   :  { %s527_s9 = smov 0   ;;  %s529_s10 = smov 0   ;;  %s591_s0 = inlined_call_operand.vmem [shape: bf16[2,16,64], index: 0, kind: input, shape index: {}]   ;;  %s592_s1 = inlined_call_operand.vmem [shape: bf16[64,32], index: 1, kind: input, shape index: {}]   ;;  %s593_s2 = inlined_call_operand.vmem [shape: f32[2,16,32], index: 2, kind: output, shape index: {}]  }
   0x1   :  { %s531_s11 = smov 0  }
   0x2 LB: > { %s24_s12 = sadd.s32 1, %s506_s10  ;;  %p423_p0 = scmp.ge.s32.totalorder %s510_s11, 1  ;;  %s510_s11 = sphi %s531_s11, %s12_s11   ;;  %s506_s10 = sphi %s529_s10, %s595_s10   ;;  %s502_s9 = sphi %s527_s9, %s594_s9  }
   0x3   : > { %p26_p1 = scmp.ge.s32.totalorder %s24_s12, 2  ;;  %p133_p2 = scmp.lt.s32.totalorder %s510_s11, 3 }
   0x5   : > { %s597_s12 = smov (%p26_p1, %s24_s12), 0  ;;  %p134_p3 = pnand %p423_p0, %p133_p2 }
   0x6   : > { %p164_p4 = scmp.lt.s32.totalorder (!%p134_p3), %s502_s9, 1 }
   0x7   : > { %137 = sbr.rel (%p134_p3) target bundleno = 214 (0xd6), region = 28 }
   0xc   : > { %v459_v0 = vld [vmem:[%s592_s1 + $0x18] sm:$0xff]  ;;  %v458_v1 = vld [vmem:[%s592_s1 + $0x10] sm:$0xff]  ;;  %s599_s9 = smov (!%p164_p4, %s502_s9), 1  ;;  %v457_v2 = vld [vmem:[%s592_s1 + $0x8] sm:$0xff]  ;;  %vm223_vm0 = vcmask 523264   ;;  %vm329_vm6 = vcmask 261120  }
   0xd   : > { %231 = vmatpush.bf16.msra.mxu0 %v459_v0  ;;  %s453_s19 = sshll.u32 %s599_s9, 3  ;;  %v456_v3 = vld [vmem:[%s592_s1] sm:$0xff]  ;;  %s454_s25 = sshll.u32 %s599_s9, 4 }
   0xe   : > { %s171_s24 = scalar_lea.vmem %s591_s0, %s453_s19  ;;  %s181_s28 = scalar_lea.vmem %s593_s2, %s454_s25 }
   0xf   : > { %v455_v4 = vld [vmem:[%s171_s24] sm:$0xff] }
  0x11   : > { %232 = vmatpush.bf16.msra.mxu0 %v458_v1 }
  0x15   : > { %233 = vmatpush.bf16.msra.mxu0 %v457_v2 }
  0x19   : > { %234 = vmatpush.bf16.msra.mxu0 %v456_v3 }
  0x1c   : > { %448 = vmatmul.msk.bf16.vlgmr.msra.gmra.mxu0 %vm223_vm0, %v455_v4 }
  0x99   : > { %v563_v5 = vpop.f32.mrf.mxu0 }
  0x9a   : > { %v243_v6 = vmul.f32 0.70710677, %v563_v5 }
  0x9c   : > { %v245_v7 = vmul.f32 %v243_v6, %v243_v6 }
  0x9e   : > { %v246_v8 = vmin.f32 %v245_v7, 16.0 }
  0xa0   : > { %v247_v9 = vmul.f32 2.1237322e-06, %v246_v8  ;;  %v258_v10 = vmul.f32 3.8918573e-05, %v246_v8 }
  0xa1   : > { %v566_v11 = vpop.f32.mrf.mxu0 }
  0xa2   : > { %v248_v12 = vadd.f32 0.00028619796, %v247_v9  ;;  %v259_v13 = vadd.f32 0.001143296, %v258_v10  ;;  %v569_v14 = vmul.f32 0.70710677, %v566_v11 }
  0xa3   : > { %v241_v10 = vmul.f32 0.5, %v563_v5 }
  0xa4   : > { %v249_v15 = vmul.f32 %v248_v12, %v246_v8  ;;  %v260_v16 = vmul.f32 %v259_v13, %v246_v8  ;;  %v285_v17 = vmul.f32 %v569_v14, %v569_v14 }
  0xa6   : > { %v261_v18 = vadd.f32 0.014752088, %v260_v16  ;;  %v250_v19 = vadd.f32 0.0036580483, %v249_v15  ;;  %v286_v20 = vmin.f32 %v285_v17, 16.0 }
  0xa8   : > { %v262_v21 = vmul.f32 %v261_v18, %v246_v8  ;;  %v287_v22 = vmul.f32 2.1237322e-06, %v286_v20  ;;  %v298_v23 = vmul.f32 3.8918573e-05, %v286_v20  ;;  %v251_v25 = vmul.f32 %v250_v19, %v246_v8 }
  0xaa   : > { %v263_v24 = vadd.f32 0.112945676, %v262_v21  ;;  %v288_v26 = vadd.f32 0.00028619796, %v287_v22  ;;  %v299_v27 = vadd.f32 0.001143296, %v298_v23 }
  0xab   : > { %v252_v32 = vadd.f32 0.05243302, %v251_v25 }
  0xac   : > { %v264_v28 = vmul.f32 %v263_v24, %v246_v8  ;;  %v289_v29 = vmul.f32 %v288_v26, %v286_v20  ;;  %v300_v30 = vmul.f32 %v299_v27, %v286_v20 }
  0xad   : > { %v253_v38 = vmul.f32 %v252_v32, %v246_v8 }
  0xae   : > { %v265_v31 = vadd.f32 0.4994258, %v264_v28  ;;  %v301_v33 = vadd.f32 0.014752088, %v300_v30  ;;  %v290_v35 = vadd.f32 0.0036580483, %v289_v29 }
  0xaf   : > { %v254_v42 = vadd.f32 0.18741608, %v253_v38 }
  0xb0   : > { %v266_v34 = vmul.f32 %v265_v31, %v246_v8  ;;  %v302_v36 = vmul.f32 %v301_v33, %v286_v20  ;;  %v291_v40 = vmul.f32 %v290_v35, %v286_v20 }
  0xb1   : > { %v255_v47 = vmul.f32 %v254_v42, %v246_v8 }
  0xb2   : > { %v267_v37 = vadd.f32 1.0, %v266_v34  ;;  %v303_v39 = vadd.f32 0.112945676, %v302_v36  ;;  %v292_v44 = vadd.f32 0.05243302, %v291_v40 }
  0xb3   : > { %v256_v53 = vadd.f32 1.1283791, %v255_v47 }
  0xb4   : > { %484 = vrcp.f32 %v267_v37  ;;  %v304_v41 = vmul.f32 %v303_v39, %v286_v20  ;;  %v293_v50 = vmul.f32 %v292_v44, %v286_v20  ;;  %v279_v52 = vand.u32 2147483648, %v267_v37 }
  0xb5   : > { %v277_v55 = vand.u32 2147483647, %v267_v37  ;;  %vm273_vm2 = vweird.f32 %v267_v37  ;;  %v257_v60 = vmul.f32 %v256_v53, %v243_v6 }
  0xb6   : > { %v305_v43 = vadd.f32 0.4994258, %v304_v41  ;;  %v294_v56 = vadd.f32 0.18741608, %v293_v50  ;;  %v280_v58 = vor.u32 1.1754944e-38, %v279_v52 }
  0xb7   : > { %vm278_vm4 = vcmp.eq.f32.partialorder %v277_v55, 8.507059e+37 }
  0xb8   : > { %v306_v45 = vmul.f32 %v305_v43, %v286_v20  ;;  %v295_v63 = vmul.f32 %v294_v56, %v286_v20  ;;  %v242_v20 = vmul.f32 0.5, %v566_v11 }
  0xba   : > { %v485_v46 = vpop.eup %484  ;;  %v307_v49 = vadd.f32 1.0, %v306_v45  ;;  %v296_v7 = vadd.f32 1.1283791, %v295_v63 }
  0xbb   : > { %v269_v48 = vmul.f32 %v485_v46, %v267_v37  ;;  %vm274_vm1 = vweird.f32 %v485_v46 }
  0xbc   : > { %486 = vrcp.f32 %v307_v49  ;;  %vm275_vm3 = vmor %vm273_vm2, %vm274_vm1  ;;  %v319_v4 = vand.u32 2147483648, %v307_v49  ;;  %v317_v9 = vand.u32 2147483647, %v307_v49  ;;  %vm313_vm7 = vweird.f32 %v307_v49 }
  0xbd   : > { %v270_v51 = vsub.f32 1.0, %v269_v48  ;;  %v297_v16 = vmul.f32 %v296_v7, %v569_v14 }
  0xbe   : > { %v320_v15 = vor.u32 1.1754944e-38, %v319_v4  ;;  %vm318_vm9 = vcmp.eq.f32.partialorder %v317_v9, 8.507059e+37 }
  0xbf   : > { %v271_v54 = vmul.f32 %v485_v46, %v270_v51 }
  0xc1   : > { %v272_v57 = vadd.f32 %v485_v46, %v271_v54 }
  0xc2   : > { %v487_v59 = vpop.eup %486 }
  0xc3   : > { %v276_v61 = vsel %vm275_vm3, %v485_v46, %v272_v57  ;;  %v309_v0 = vmul.f32 %v487_v59, %v307_v49  ;;  %vm314_vm5 = vweird.f32 %v487_v59 }
  0xc4   : > { %v281_v62 = vsel %vm278_vm4, %v280_v58, %v276_v61  ;;  %vm315_vm8 = vmor %vm313_vm7, %vm314_vm5 }
  0xc5   : > { %v282_v1 = vmul.f32 %v281_v62, %v257_v60  ;;  %v310_v2 = vsub.f32 1.0, %v309_v0 }
  0xc7   : > { %v449_v3 = vclamps-f32 %v282_v1, 1.0  ;;  %v311_v8 = vmul.f32 %v487_v59, %v310_v2 }
  0xc9   : > { %v325_v12 = vadd.f32 1.0, %v449_v3  ;;  %v312_v6 = vadd.f32 %v487_v59, %v311_v8 }
  0xcb   : > { %v327_v13 = vmul.f32 %v325_v12, %v241_v10  ;;  %v316_v17 = vsel %vm315_vm8, %v487_v59, %v312_v6 }
  0xcc   : > { %v321_v18 = vsel %vm318_vm9, %v320_v15, %v316_v17 }
  0xcd   : > { %330 = vst.msk [vmem:[%s181_s28] sm:$0xff] %vm329_vm6, %v327_v13  ;;  %v322_v19 = vmul.f32 %v321_v18, %v297_v16 }
  0xcf   : > { %v450_v5 = vclamps-f32 %v322_v19, 1.0 }
  0xd1   : > { %v326_v21 = vadd.f32 1.0, %v450_v5 }
  0xd3   : > { %v328_v22 = vmul.f32 %v326_v21, %v242_v20 }
  0xd5   : > { %331 = vst.msk [vmem:[%s181_s28 + $0x8] sm:$0xff] %vm329_vm6, %v328_v22 }
  0xd6 PF: > { %s12_s11 = sadd.s32 1, %s510_s11   ;;  %s594_s9 = smov %s506_s10 }
  0xd7   : > { %p9_p5 = scmp.ge.s32.totalorder %s12_s11, 4   ;;  %s595_s10 = smov %s597_s12 }
  0xd9   :  { %11 = sbr.rel (!%p9_p5) target bundleno = 2 (0x2), region = 58 }

// kernel: conv_feature_extraction_forward.3
= control target key start
LH: loop header
LB: loop body
LE: loop exit
PB: predicated region body
PF: predicated region fallthrough
CT: control target
= control target key end

     0   :  { %s1203_s18 = smov 0   ;;  %s1205_s19 = smov 0   ;;  %s1606_s0 = inlined_call_operand.vmem [shape: f32[2,64,5], index: 0, kind: input, shape index: {}, may-alias: {0,1}]   ;;  %s1607_s1 = inlined_call_operand.vmem [shape: f32[2,64,5], index: 1, kind: input, shape index: {}, may-alias: {0,1}]   ;;  %s1608_s2 = inlined_call_operand.vmem [shape: bf16[10,16], index: 2, kind: input, shape index: {}]   ;;  %s1609_s3 = inlined_call_operand.vmem [shape: f32[1,16], index: 3, kind: input, shape index: {}]   ;;  %s1610_s4 = inlined_call_operand.vmem [shape: f32[1,16], index: 4, kind: input, shape index: {}]   ;;  %s1611_s5 = inlined_call_operand.vmem [shape: bf16[2,56,16], index: 5, kind: output, shape index: {}]  }
   0x1   :  { %s1207_s20 = smov 0  }
   0x2 LB: > { %s27_s21 = sadd.s32 1, %s1166_s19  ;;  %p1070_p0 = scmp.ge.s32.totalorder %s1170_s20, 1  ;;  %s1170_s20 = sphi %s1207_s20, %s15_s20   ;;  %s1166_s19 = sphi %s1205_s19, %s1627_s19   ;;  %s1162_s18 = sphi %s1203_s18, %s1626_s18  }
   0x3   : > { %p29_p1 = scmp.ge.s32.totalorder %s27_s21, 2  ;;  %p239_p2 = scmp.lt.s32.totalorder %s1170_s20, 3 }
   0x5   : > { %s1629_s21 = smov (%p29_p1, %s27_s21), 0  ;;  %p240_p3 = pnand %p1070_p0, %p239_p2 }
   0x6   : > { %p294_p4 = scmp.lt.s32.totalorder (!%p240_p3), %s1162_s18, 1 }
   0x7   : > { %243 = sbr.rel (%p240_p3) target bundleno = 334 (0x14e), region = 40 }
   0xc   : > { %v371_v0 = vld [vmem:[%s1608_s2] sm:$0xf]  ;;  %vm430_vm0 = vcmask 1041408   ;;  %vm431_vm1 = vcmask 1042432   ;;  %v1172_v1 = vmov 65535   ;;  %s1631_s18 = smov (!%p294_p4, %s1162_s18), 1 }
   0xd   : > { %v432_v2 = vsel %vm430_vm0, 4294967295, %v1172_v1  ;;  %v1078_v3 = vld [vmem:[%s1608_s2] sm:$0xf]  ;;  %v1100_v4 = vld [vmem:[%s1608_s2] sm:$0x10]  ;;  %s1097_s28 = sshll.u32 %s1631_s18, 6 }
   0xe   : > { %v433_v5 = vsel %vm431_vm1, %v432_v2, 0  ;;  %v1079_v6 = vor.u32 %v1100_v4, %v1078_v3  ;;  %s301_s6 = scalar_lea.vmem %s1606_s0, %s1097_s28  ;;  %s1099_s7 = sadd.s32 56, %s1097_s28  ;;  %vm417_vm2 = vcmask 39936   ;;  %vm367_vm3 = vcmask 1043456  }
   0xf   : > { %v474_v7 = vand.u32 %v433_v5, %v371_v0  ;;  %v330_v10 = vld [vmem:[%s301_s6] sm:$0xff]  ;;  %v331_v11 = vld [vmem:[%s301_s6 + $0x8] sm:$0xff]  ;;  %s316_s10 = scalar_lea.vmem %s1607_s1, %s1099_s7  ;;  %v332_v19 = vld [vmem:[%s301_s6 + $0x10] sm:$0xff]  ;;  %vm373_vm4 = vsmask.f32 7424  ;;  %vm540_vm5 = vcmask 130048  }
  0x10   : > { %v410_v8 = vshrl.u32 %v1079_v6, 16  ;;  %v413_v9 = vshll.u32 %v1079_v6, 16  ;;  %v334_v14 = vld [vmem:[%s301_s6 + $0x20] sm:$0xff]  ;;  %v337_v15 = vpack.c.bf16 %v330_v10, %v330_v10  ;;  %v338_v16 = vpack.c.bf16 %v331_v11, %v331_v11  ;;  %v335_v17 = vld [vmem:[%s301_s6 + $0x28] sm:$0xff]  ;;  %v333_v20 = vld [vmem:[%s301_s6 + $0x18] sm:$0xff]  ;;  %s1104_s15 = smul.u32 28, %s1631_s18 }
  0x11   : > { %483 = vmatpush.bf16.msra.mxu1 %v474_v7  ;;  %1103 = vmatpush.bf16.msra.mxu3 %v474_v7  ;;  %v341_v18 = vpack.c.bf16 %v334_v14, %v334_v14  ;;  %v342_v22 = vpack.c.bf16 %v335_v17, %v335_v17  ;;  %v339_v23 = vpack.c.bf16 %v332_v19, %v332_v19  ;;  %v336_v25 = vld [vmem:[%s301_s6 + $0x30] sm:$0xff]  ;;  %v344_v26 = vld [vmem:[%s316_s10] sm:$0xff]  ;;  %v504_v6 = vlaneseq }
  0x12   : > { %v412_v12 = vrot.slane %v410_v8, 2  ;;  %v415_v13 = vrot.slane %v413_v9, 3  ;;  %v340_v24 = vpack.c.bf16 %v333_v20, %v333_v20  ;;  %v353_v27 = vunpack.c.l.b16 %v337_v15  ;;  %s1572_s18 = scalar_lea.vmem %s1611_s5, %s1104_s15 }
  0x13   : > { %v354_v28 = vunpack.c.l.b16 %v338_v16  ;;  %v357_v29 = vunpack.c.l.b16 %v341_v18  ;;  %v343_v30 = vpack.c.bf16 %v336_v25, %v336_v25  ;;  %v358_v32 = vunpack.c.l.b16 %v342_v22 }
  0x14   : > { %v416_v21 = vor.u32 %v415_v13, %v412_v12  ;;  %v355_v33 = vunpack.c.l.b16 %v339_v23  ;;  %v356_v34 = vunpack.c.l.b16 %v340_v24  ;;  %v345_v36 = vpack.c.bf16 %v344_v26, %v344_v26 }
  0x15   : > { %v360_v35 = vpack.c.b16 %v354_v28, %v353_v27  ;;  %v359_v37 = vunpack.c.l.b16 %v343_v30  ;;  %v362_v38 = vpack.c.b16 %v358_v32, %v357_v29  ;;  %v505_v11 = vshrl.u32 %v504_v6, 7 }
  0x16   : > { %v435_v31 = vand.u32 %v433_v5, %v416_v21  ;;  %v361_v39 = vpack.c.b16 %v356_v34, %v355_v33  ;;  %v365_v43 = vunpack.c.l.b16 %v345_v36 }
  0x17   : > { %v377_v40 = vshll.u32 %v360_v35, 16  ;;  %1084 = vmatmul.msk.bf16.vlgmr.msra.gmra.mxu1 %vm417_vm2, %v360_v35  ;;  %v375_v41 = vshrl.u32 %v360_v35, 16  ;;  %v363_v42 = vpack.c.b16 %v359_v37, %v359_v37  ;;  %v390_v44 = vshll.u32 %v362_v38, 16  ;;  %1086 = vmatmul.msk.bf16.vlgmr.msra.gmra.mxu3 %vm417_vm2, %v362_v38 }
  0x18   : > { %444 = vmatpush.bf16.msra.mxu0 %v435_v31  ;;  %1102 = vmatpush.bf16.msra.mxu2 %v435_v31  ;;  %v382_v45 = vshll.u32 %v361_v39, 16  ;;  %v394_v46 = vshrl.u32 %v362_v38, 16  ;;  %v366_v48 = vpack.c.b16 %v365_v43, %v365_v43  ;;  %v386_v58 = vshrl.u32 %v361_v39, 16 }
  0x19   : > { %v379_v47 = vrot.slane %v377_v40, 1  ;;  %v392_v50 = vrot.slane %v390_v44, 1  ;;  %v511_v16 = vadd.s32 48, %v505_v11 }
  0x1a   : > { %v384_v49 = vrot.slane %v382_v45, 1  ;;  %v370_v52 = vsel %vm367_vm3, %v363_v42, %v366_v48 }
  0x1b   : > { %v380_v51 = vor.u32 %v379_v47, %v375_v41  ;;  %v396_v53 = vor.u32 %v394_v46, %v392_v50  ;;  %v397_v54 = vshll.u32 %v370_v52, 16  ;;  %v401_v60 = vshrl.u32 %v370_v52, 16 }
  0x1c   : > { %v388_v59 = vor.u32 %v386_v58, %v384_v49  ;;  %vm518_vm6 = vcmp.lt.s32.totalorder %v511_v16, 50 }
  0x1d   : > { %v385_v55 = vsel %vm373_vm4, %v380_v51, %v384_v49  ;;  %v399_v56 = vrot.slane %v397_v54, 1 }
  0x1e   : > { %1080 = vmatmul.msk.bf16.vlgmr.msra.gmra.mxu0 %vm417_vm2, %v385_v55  ;;  %v393_v61 = vsel %vm373_vm4, %v388_v59, %v392_v50 }
  0x1f   : > { %v400_v57 = vsel %vm373_vm4, %v396_v53, %v399_v56  ;;  %v403_v62 = vor.u32 %v401_v60, %v399_v56 }
  0x20   : > { %1082 = vmatmul.msk.bf16.vlgmr.msra.gmra.mxu2 %vm417_vm2, %v400_v57 }
  0x27   : > { %1085 = vmatmul.msk.bf16.gmra.mxu1 %vm417_vm2, %v361_v39  ;;  %1087 = vmatmul.msk.bf16.gmra.mxu3 %vm417_vm2, %v370_v52 }
  0x2e   : > { %1081 = vmatmul.msk.bf16.gmra.mxu0 %vm417_vm2, %v393_v61 }
  0x30   : > { %1083 = vmatmul.msk.bf16.gmra.mxu2 %vm417_vm2, %v403_v62 }
  0x94   : > { %v485_v63 = vpop.f32.mrf.mxu1 }
  0x9a   : > { %v495_v1 = vpop.f32.mrf.mxu3 }
  0x9b   : > { %v446_v0 = vpop.f32.mrf.mxu0 }
  0x9c   : > { %v487_v2 = vpop.f32.mrf.mxu1  ;;  %v1252_v12 = vadd.f32 %v485_v63, %v446_v0 }
  0x9e   : > { %v561_v17 = vmul.f32 %v1252_v12, %v1252_v12  ;;  %v541_v20 = vsel %vm540_vm5, %v1252_v12, 0.0 }
  0xa0   : > { %v568_v28 = vsel %vm540_vm5, %v561_v17, 0.0 }
  0xa2   : > { %v497_v4 = vpop.f32.mrf.mxu3 }
  0xa3   : > { %v448_v3 = vpop.f32.mrf.mxu0  ;;  %v456_v5 = vpop.f32.mrf.mxu2 }
  0xa4   : > { %v490_v7 = vpop.f32.mrf.mxu1  ;;  %v1250_v8 = vadd.f32 %v487_v2, %v448_v3  ;;  %v1266_v21 = vadd.f32 %v495_v1, %v456_v5 }
  0xa6   : > { %v562_v15 = vmul.f32 %v1250_v8, %v1250_v8  ;;  %v542_v18 = vsel %vm540_vm5, %v1250_v8, 0.0  ;;  %v565_v36 = vmul.f32 %v1266_v21, %v1266_v21  ;;  %v548_v42 = vsel %vm540_vm5, %v1266_v21, 0.0 }
  0xa7   : > { %v543_v25 = vadd.f32 %v542_v18, %v541_v20 }
  0xa8   : > { %v569_v22 = vsel %vm540_vm5, %v562_v15, 0.0  ;;  %v575_v48 = vsel %vm540_vm5, %v565_v36, 0.0 }
  0xa9   : > { %v570_v33 = vadd.f32 %v569_v22, %v568_v28 }
  0xaa   : > { %v500_v10 = vpop.f32.mrf.mxu3 }
  0xab   : > { %v451_v9 = vpop.f32.mrf.mxu0  ;;  %v458_v13 = vpop.f32.mrf.mxu2 }
  0xac   : > { %v1254_v14 = vadd.f32 %v490_v7, %v451_v9  ;;  %v492_v24 = vpop.f32.mrf.mxu1  ;;  %v1272_v29 = vadd.f32 %v497_v4, %v458_v13 }
  0xae   : > { %v563_v19 = vmul.f32 %v1254_v14, %v1254_v14  ;;  %v544_v23 = vsel %vm540_vm5, %v1254_v14, 0.0  ;;  %v566_v43 = vmul.f32 %v1272_v29, %v1272_v29  ;;  %v550_v49 = vsel %vm540_vm5, %v1272_v29, 0.0 }
  0xaf   : > { %v545_v34 = vadd.f32 %v544_v23, %v543_v25 }
  0xb0   : > { %v571_v30 = vsel %vm540_vm5, %v563_v19, 0.0  ;;  %v577_v53 = vsel %vm540_vm5, %v566_v43, 0.0 }
  0xb1   : > { %v572_v39 = vadd.f32 %v571_v30, %v570_v33 }
  0xb2   : > { %v502_v27 = vpop.f32.mrf.mxu3 }
  0xb3   : > { %v453_v26 = vpop.f32.mrf.mxu0  ;;  %v461_v31 = vpop.f32.mrf.mxu2  ;;  %v1130_v27 = vld [vmem:[%s1609_s3] ss:$0 sm:$0xff] }
  0xb4   : > { %v1275_v32 = vadd.f32 %v492_v24, %v453_v26  ;;  %v1277_v35 = vadd.f32 %v500_v10, %v461_v31 }
  0xb6   : > { %v546_v37 = vsel %vm540_vm5, %v1275_v32, 0.0  ;;  %v564_v38 = vmul.f32 %v1275_v32, %v1275_v32  ;;  %v539_v40 = vsel %vm518_vm6, %v1277_v35, 0.0 }
  0xb7   : > { %v547_v41 = vadd.f32 %v546_v37, %v545_v34  ;;  %v567_v44 = vmul.f32 %v539_v40, %v539_v40  ;;  %v552_v50 = vsel %vm540_vm5, %v539_v40, 0.0 }
  0xb8   : > { %v573_v45 = vsel %vm540_vm5, %v564_v38, 0.0 }
  0xb9   : > { %v549_v46 = vadd.f32 %v548_v42, %v547_v41  ;;  %v574_v47 = vadd.f32 %v573_v45, %v572_v39  ;;  %v579_v54 = vsel %vm540_vm5, %v567_v44, 0.0 }
  0xbb   : > { %v551_v51 = vadd.f32 %v550_v49, %v549_v46  ;;  %v576_v52 = vadd.f32 %v575_v48, %v574_v47  ;;  %v463_v55 = vpop.f32.mrf.mxu2 }
  0xbd   : > { %v553_v56 = vadd.f32 %v552_v50, %v551_v51  ;;  %v578_v57 = vadd.f32 %v577_v53, %v576_v52 }
  0xbf   : > { %v554_v58 = vrot.slane %v553_v56, 4  ;;  %v580_v59 = vadd.f32 %v579_v54, %v578_v57 }
  0xc1   : > { %v555_v60 = vadd.f32 %v554_v58, %v553_v56  ;;  %v581_v61 = vrot.slane %v580_v59, 4 }
  0xc3   : > { %v556_v62 = vrot.slane %v555_v60, 2  ;;  %v582_v63 = vadd.f32 %v581_v61, %v580_v59 }
  0xc5   : > { %v557_v0 = vadd.f32 %v556_v62, %v555_v60  ;;  %v583_v1 = vrot.slane %v582_v63, 2 }
  0xc7   : > { %v558_v2 = vrot.slane %v557_v0, 1  ;;  %v584_v3 = vadd.f32 %v583_v1, %v582_v63 }
  0xc9   : > { %v559_v4 = vadd.f32 %v558_v2, %v557_v0  ;;  %v585_v5 = vrot.slane %v584_v3, 1 }
  0xcb   : > { %v560_v6 = vmul.f32 0.02, %v559_v4  ;;  %v586_v7 = vadd.f32 %v585_v5, %v584_v3 }
  0xcd   : > { %v587_v9 = vmul.f32 0.02, %v586_v7  ;;  %v588_v10 = vmul.f32 %v560_v6, %v560_v6  ;;  %v591_v23 = vsub.f32 %v1252_v12, %v560_v6  ;;  %v592_v24 = vsub.f32 %v1250_v8, %v560_v6  ;;  %v1308_v8 = vld [vmem:[%s1610_s4] ss:$0 sm:$0xff] }
  0xce   : > { %v593_v25 = vsub.f32 %v1254_v14, %v560_v6  ;;  %v594_v26 = vsub.f32 %v1275_v32, %v560_v6  ;;  %v595_v28 = vsub.f32 %v1266_v21, %v560_v6  ;;  %v596_v48 = vsub.f32 %v1272_v29, %v560_v6 }
  0xcf   : > { %v589_v11 = vsub.f32 %v587_v9, %v588_v10  ;;  %v597_v50 = vsub.f32 %v1277_v35, %v560_v6 }
  0xd1   : > { %v590_v13 = vmax.f32 %v589_v11, 0.0 }
  0xd3   : > { %v598_v15 = vadd.f32 1e-05, %v590_v13 }
  0xd5   : > { %1132 = vrsqrt.f32 %v598_v15  ;;  %vm605_vm8 = vweird.f32 %v598_v15 }
  0xdb   : > { %v1133_v16 = vpop.eup %1132 }
  0xdc   : > { %v600_v17 = vmul.f32 %v1133_v16, %v598_v15  ;;  %vm606_vm7 = vweird.f32 %v1133_v16 }
  0xdd   : > { %vm607_vm9 = vmor %vm605_vm8, %vm606_vm7 }
  0xde   : > { %v601_v18 = vmul.f32 %v1133_v16, %v600_v17 }
  0xe0   : > { %v602_v19 = vmul.f32 0.5, %v601_v18 }
  0xe2   : > { %v603_v20 = vsub.f32 1.5, %v602_v19 }
  0xe4   : > { %v604_v22 = vmul.f32 %v1133_v16, %v603_v20 }
  0xe6   : > { %v608_v30 = vsel %vm607_vm9, %v1133_v16, %v604_v22 }
  0xe7   : > { %v609_v31 = vmul.f32 %v608_v30, %v591_v23  ;;  %v610_v33 = vmul.f32 %v608_v30, %v592_v24  ;;  %v611_v34 = vmul.f32 %v608_v30, %v593_v25  ;;  %v612_v36 = vmul.f32 %v608_v30, %v594_v26 }
  0xe8   : > { %v613_v12 = vmul.f32 %v608_v30, %v595_v28  ;;  %v614_v54 = vmul.f32 %v608_v30, %v596_v48  ;;  %v615_v56 = vmul.f32 %v608_v30, %v597_v50 }
  0xe9   : > { %v620_v14 = vmul.f32 %v1130_v27, %v609_v31  ;;  %v621_v32 = vmul.f32 %v1130_v27, %v610_v33  ;;  %v622_v37 = vmul.f32 %v1130_v27, %v611_v34  ;;  %v623_v38 = vmul.f32 %v1130_v27, %v612_v36 }
  0xea   : > { %v624_v39 = vmul.f32 %v1130_v27, %v613_v12  ;;  %v625_v0 = vmul.f32 %v1130_v27, %v614_v54  ;;  %v626_v4 = vmul.f32 %v1130_v27, %v615_v56 }
  0xeb   : > { %v1311_v40 = vadd.f32 %v1308_v8, %v620_v14  ;;  %v1314_v21 = vadd.f32 %v1308_v8, %v621_v32  ;;  %v1317_v41 = vadd.f32 %v1308_v8, %v622_v37  ;;  %v1320_v42 = vadd.f32 %v1308_v8, %v623_v38 }
  0xec   : > { %v1326_v44 = vadd.f32 %v1308_v8, %v624_v39  ;;  %v1373_v24 = vadd.f32 %v1308_v8, %v625_v0 }
  0xed   : > { %v1323_v43 = vmul.f32 0.70710677, %v1311_v40  ;;  %v1329_v45 = vmul.f32 0.70710677, %v1314_v21  ;;  %v1332_v46 = vmul.f32 0.70710677, %v1317_v41 }
  0xee   : > { %v1335_v47 = vmul.f32 0.70710677, %v1320_v42  ;;  %v1350_v29 = vmul.f32 0.70710677, %v1326_v44 }
  0xef   : > { %v652_v49 = vmul.f32 %v1323_v43, %v1323_v43  ;;  %v692_v51 = vmul.f32 %v1329_v45, %v1329_v45  ;;  %v732_v52 = vmul.f32 %v1332_v46, %v1332_v46 }
  0xf0   : > { %v772_v53 = vmul.f32 %v1335_v47, %v1335_v47 }
  0xf1   : > { %v1347_v55 = vmin.f32 %v652_v49, 16.0  ;;  %v1352_v57 = vmin.f32 %v692_v51, 16.0  ;;  %v1354_v58 = vmin.f32 %v732_v52, 16.0 }
  0xf2   : > { %v1358_v60 = vmin.f32 %v772_v53, 16.0 }
  0xf3   : > { %v654_v35 = vmul.f32 2.1237322e-06, %v1347_v55  ;;  %v665_v59 = vmul.f32 3.8918573e-05, %v1347_v55  ;;  %v694_v61 = vmul.f32 2.1237322e-06, %v1352_v57 }
  0xf4   : > { %v705_v62 = vmul.f32 3.8918573e-05, %v1352_v57  ;;  %v734_v63 = vmul.f32 2.1237322e-06, %v1354_v58  ;;  %v745_v3 = vmul.f32 3.8918573e-05, %v1354_v58 }
  0xf5   : > { %v655_v1 = vadd.f32 0.00028619796, %v654_v35  ;;  %v666_v2 = vadd.f32 0.001143296, %v665_v59  ;;  %v695_v5 = vadd.f32 0.00028619796, %v694_v61 }
  0xf6   : > { %v706_v6 = vadd.f32 0.001143296, %v705_v62  ;;  %v735_v7 = vadd.f32 0.00028619796, %v734_v63  ;;  %v746_v11 = vadd.f32 0.001143296, %v745_v3 }
  0xf7   : > { %v656_v9 = vmul.f32 %v655_v1, %v1347_v55  ;;  %v667_v10 = vmul.f32 %v666_v2, %v1347_v55  ;;  %v774_v13 = vmul.f32 2.1237322e-06, %v1358_v60  ;;  %v696_v15 = vmul.f32 %v695_v5, %v1352_v57 }
  0xf8   : > { %v707_v16 = vmul.f32 %v706_v6, %v1352_v57  ;;  %v736_v17 = vmul.f32 %v735_v7, %v1354_v58  ;;  %v785_v18 = vmul.f32 3.8918573e-05, %v1358_v60  ;;  %v747_v22 = vmul.f32 %v746_v11, %v1354_v58 }
  0xf9   : > { %v657_v19 = vadd.f32 0.0036580483, %v656_v9  ;;  %v668_v20 = vadd.f32 0.014752088, %v667_v10  ;;  %v775_v23 = vadd.f32 0.00028619796, %v774_v13  ;;  %v812_v13 = vmul.f32 %v1350_v29, %v1350_v29 }
  0xfa   : > { %v697_v25 = vadd.f32 0.0036580483, %v696_v15  ;;  %v708_v26 = vadd.f32 0.014752088, %v707_v16  ;;  %v737_v27 = vadd.f32 0.0036580483, %v736_v17  ;;  %v1398_v15 = vadd.f32 %v1308_v8, %v626_v4 }
  0xfb   : > { %v658_v28 = vmul.f32 %v657_v19, %v1347_v55  ;;  %v669_v30 = vmul.f32 %v668_v20, %v1347_v55  ;;  %v748_v31 = vadd.f32 0.014752088, %v747_v22  ;;  %v776_v33 = vmul.f32 %v775_v23, %v1358_v60 }
  0xfc   : > { %v698_v34 = vmul.f32 %v697_v25, %v1352_v57  ;;  %v709_v36 = vmul.f32 %v708_v26, %v1352_v57  ;;  %v738_v12 = vmul.f32 %v737_v27, %v1354_v58  ;;  %v786_v14 = vadd.f32 0.001143296, %v785_v18 }
  0xfd   : > { %v659_v32 = vadd.f32 0.05243302, %v658_v28  ;;  %v670_v37 = vadd.f32 0.112945676, %v669_v30  ;;  %v749_v38 = vmul.f32 %v748_v31, %v1354_v58  ;;  %v777_v39 = vadd.f32 0.0036580483, %v776_v33 }
  0xfe   : > { %v699_v48 = vadd.f32 0.05243302, %v698_v34  ;;  %v710_v49 = vadd.f32 0.112945676, %v709_v36  ;;  %v739_v50 = vadd.f32 0.05243302, %v738_v12  ;;  %v787_v51 = vmul.f32 %v786_v14, %v1358_v60 }
  0xff   : > { %v660_v52 = vmul.f32 %v659_v32, %v1347_v55  ;;  %v671_v53 = vmul.f32 %v670_v37, %v1347_v55  ;;  %v750_v54 = vadd.f32 0.112945676, %v749_v38  ;;  %v778_v56 = vmul.f32 %v777_v39, %v1358_v60 }
 0x100   : > { %v700_v35 = vmul.f32 %v699_v48, %v1352_v57  ;;  %v711_v59 = vmul.f32 %v710_v49, %v1352_v57  ;;  %v740_v61 = vmul.f32 %v739_v50, %v1354_v58  ;;  %v788_v62 = vadd.f32 0.014752088, %v787_v51 }
 0x101   : > { %v661_v63 = vadd.f32 0.18741608, %v660_v52  ;;  %v672_v0 = vadd.f32 0.4994258, %v671_v53  ;;  %v751_v1 = vmul.f32 %v750_v54, %v1354_v58  ;;  %v779_v2 = vadd.f32 0.05243302, %v778_v56 }
 0x102   : > { %v701_v3 = vadd.f32 0.18741608, %v700_v35  ;;  %v712_v5 = vadd.f32 0.4994258, %v711_v59  ;;  %v741_v6 = vadd.f32 0.18741608, %v740_v61  ;;  %v789_v7 = vmul.f32 %v788_v62, %v1358_v60 }
 0x103   : > { %v1392_v9 = vmul.f32 0.70710677, %v1373_v24  ;;  %v673_v10 = vmul.f32 %v672_v0, %v1347_v55  ;;  %v752_v11 = vadd.f32 0.4994258, %v751_v1  ;;  %v662_v16 = vmul.f32 %v661_v63, %v1347_v55 }
 0x104   : > { %v713_v17 = vmul.f32 %v712_v5, %v1352_v57  ;;  %v790_v18 = vadd.f32 0.112945676, %v789_v7  ;;  %v702_v20 = vmul.f32 %v701_v3, %v1352_v57  ;;  %v780_v22 = vmul.f32 %v779_v2, %v1358_v60 }
 0x105   : > { %v1402_v19 = vadd.f32 1.0, %v673_v10  ;;  %v742_v25 = vmul.f32 %v741_v6, %v1354_v58  ;;  %v753_v26 = vmul.f32 %v752_v11, %v1354_v58  ;;  %v1412_v55 = vmin.f32 %v812_v13, 16.0 }
 0x106   : > { %v1406_v23 = vadd.f32 1.0, %v713_v17  ;;  %v791_v8 = vmul.f32 %v790_v18, %v1358_v60  ;;  %v852_v4 = vmul.f32 %v1392_v9, %v1392_v9  ;;  %v1417_v27 = vmul.f32 0.70710677, %v1398_v15 }
 0x107   : > { %1134 = vrcp.f32 %v1402_v19  ;;  %v663_v57 = vadd.f32 1.1283791, %v662_v16  ;;  %v703_v28 = vadd.f32 1.1283791, %v702_v20  ;;  %v781_v30 = vadd.f32 0.18741608, %v780_v22 }
 0x108   : > { %1136 = vrcp.f32 %v1406_v23  ;;  %v743_v31 = vadd.f32 1.1283791, %v742_v25  ;;  %v1420_v33 = vadd.f32 1.0, %v753_v26  ;;  %v792_v58 = vadd.f32 0.4994258, %v791_v8 }
 0x109   : > { %v686_v34 = vand.u32 2147483648, %v1402_v19  ;;  %v814_v36 = vmul.f32 2.1237322e-06, %v1412_v55  ;;  %v825_v12 = vmul.f32 3.8918573e-05, %v1412_v55  ;;  %v1425_v14 = vmin.f32 %v852_v4, 16.0 }
 0x10a   : > { %v1428_v32 = vmul.f32 %v663_v57, %v1323_v43  ;;  %v684_v37 = vand.u32 2147483647, %v1402_v19  ;;  %1138 = vrcp.f32 %v1420_v33  ;;  %v892_v38 = vmul.f32 %v1417_v27, %v1417_v27 }
 0x10b   : > { %vm680_vm10 = vweird.f32 %v1402_v19  ;;  %v1438_v48 = vmul.f32 %v703_v28, %v1329_v45  ;;  %v793_v49 = vmul.f32 %v792_v58, %v1358_v60  ;;  %v815_v50 = vadd.f32 0.00028619796, %v814_v36 }
 0x10c   : > { %v826_v51 = vadd.f32 0.001143296, %v825_v12  ;;  %v724_v53 = vand.u32 2147483647, %v1406_v23  ;;  %v726_v54 = vand.u32 2147483648, %v1406_v23  ;;  %v782_v56 = vmul.f32 %v781_v30, %v1358_v60 }
 0x10d   : > { %v1434_v39 = vpop.eup %1134  ;;  %v687_v35 = vor.u32 1.1754944e-38, %v686_v34  ;;  %v1451_v59 = vmul.f32 %v743_v31, %v1332_v46  ;;  %v1453_v61 = vadd.f32 1.0, %v793_v49  ;;  %v764_v63 = vand.u32 2147483647, %v1420_v33 }
 0x10e   : > { %v1441_v43 = vpop.eup %1136  ;;  %v676_v52 = vmul.f32 %v1434_v39, %v1402_v19  ;;  %v816_v0 = vmul.f32 %v815_v50, %v1412_v55  ;;  %v827_v1 = vmul.f32 %v826_v51, %v1412_v55  ;;  %vm1458_vm11 = vcmp.eq.f32.partialorder %v684_v37, 8.507059e+37 }
 0x10f   : > { %v716_v45 = vmul.f32 %v1441_v43, %v1406_v23  ;;  %vm720_vm12 = vweird.f32 %v1406_v23  ;;  %v766_v3 = vand.u32 2147483648, %v1420_v33  ;;  %1140 = vrcp.f32 %v1453_v61 }
 0x110   : > { %v677_v62 = vsub.f32 1.0, %v676_v52  ;;  %v854_v46 = vmul.f32 2.1237322e-06, %v1425_v14  ;;  %v1139_v5 = vpop.eup %1138  ;;  %v783_v7 = vadd.f32 1.1283791, %v782_v56  ;;  %vm681_vm13 = vweird.f32 %v1434_v39 }
 0x111   : > { %v717_v60 = vsub.f32 1.0, %v716_v45  ;;  %v817_v10 = vadd.f32 0.0036580483, %v816_v0  ;;  %v828_v11 = vadd.f32 0.014752088, %v827_v1  ;;  %v727_v16 = vor.u32 1.1754944e-38, %v726_v54  ;;  %vm1481_vm1 = vmor %vm680_vm10, %vm681_vm13 }
 0x112   : > { %v678_v6 = vmul.f32 %v1434_v39, %v677_v62  ;;  %v756_v17 = vmul.f32 %v1139_v5, %v1420_v33  ;;  %vm760_vm14 = vweird.f32 %v1420_v33  ;;  %vm721_vm15 = vweird.f32 %v1441_v43 }
 0x113   : > { %v718_v13 = vmul.f32 %v1441_v43, %v717_v60  ;;  %v818_v20 = vmul.f32 %v817_v10, %v1412_v55  ;;  %v829_v22 = vmul.f32 %v828_v11, %v1412_v55  ;;  %vm1475_vm0 = vcmp.eq.f32.partialorder %v724_v53, 8.507059e+37  ;;  %vm1509_vm5 = vmor %vm720_vm12, %vm721_vm15 }
 0x114   : > { %v679_v18 = vadd.f32 %v1434_v39, %v678_v6  ;;  %v757_v26 = vsub.f32 1.0, %v756_v17  ;;  %v767_v8 = vor.u32 1.1754944e-38, %v766_v3  ;;  %v855_v4 = vadd.f32 0.00028619796, %v854_v46 }
 0x115   : > { %vm1485_vm2 = vcmp.eq.f32.partialorder %v764_v63, 8.507059e+37  ;;  %v784_v30 = vmul.f32 %v783_v7, %v1335_v47  ;;  %v804_v31 = vand.u32 2147483647, %v1453_v61  ;;  %v830_v58 = vadd.f32 0.112945676, %v829_v22  ;;  %v1141_v36 = vpop.eup %1140 }
 0x116   : > { %v865_v34 = vmul.f32 3.8918573e-05, %v1425_v14  ;;  %v683_v19 = vsel %vm1481_vm1, %v1434_v39, %v679_v18  ;;  %v719_v12 = vadd.f32 %v1441_v43, %v718_v13  ;;  %v758_v37 = vmul.f32 %v1139_v5, %v757_v26 }
 0x117   : > { %v819_v49 = vadd.f32 0.05243302, %v818_v20  ;;  %vm761_vm3 = vweird.f32 %v1139_v5  ;;  %v796_v50 = vmul.f32 %v1141_v36, %v1453_v61  ;;  %vm800_vm4 = vweird.f32 %v1453_v61 }
 0x118   : > { %v856_v47 = vmul.f32 %v855_v4, %v1425_v14  ;;  %v759_v51 = vadd.f32 %v1139_v5, %v758_v37  ;;  %v806_v52 = vand.u32 2147483648, %v1453_v61  ;;  %v831_v53 = vmul.f32 %v830_v58, %v1412_v55  ;;  %vm1522_vm7 = vmor %vm760_vm14, %vm761_vm3 }
 0x119   : > { %v1501_v54 = vmin.f32 %v892_v38, 16.0  ;;  %v688_v39 = vsel %vm1458_vm11, %v687_v35, %v683_v19  ;;  %v797_v45 = vsub.f32 1.0, %v796_v50  ;;  %vm1513_vm6 = vcmp.eq.f32.partialorder %v804_v31, 8.507059e+37 }
 0x11a   : > { %v866_v63 = vadd.f32 0.001143296, %v865_v34  ;;  %v723_v38 = vsel %vm1509_vm5, %v1441_v43, %v719_v12  ;;  %vm801_vm8 = vweird.f32 %v1141_v36  ;;  %v820_v23 = vmul.f32 %v819_v49, %v1412_v55 }
 0x11b   : > { %v832_v0 = vadd.f32 0.4994258, %v831_v53  ;;  %v763_v1 = vsel %vm1522_vm7, %v1139_v5, %v759_v51  ;;  %v798_v2 = vmul.f32 %v1141_v36, %v797_v45  ;;  %v857_v60 = vadd.f32 0.0036580483, %v856_v47  ;;  %vm802_vm9 = vmor %vm800_vm4, %vm801_vm8 }
 0x11c   : > { %v867_v3 = vmul.f32 %v866_v63, %v1425_v14  ;;  %v689_v46 = vmul.f32 %v688_v39, %v1428_v32  ;;  %v807_v43 = vor.u32 1.1754944e-38, %v806_v52  ;;  %v894_v6 = vmul.f32 2.1237322e-06, %v1501_v54 }
 0x11d   : > { %v833_v33 = vmul.f32 %v832_v0, %v1412_v55  ;;  %v728_v7 = vsel %vm1475_vm0, %v727_v16, %v723_v38  ;;  %v799_v10 = vadd.f32 %v1141_v36, %v798_v2  ;;  %v905_v13 = vmul.f32 3.8918573e-05, %v1501_v54 }
 0x11e   : > { %v868_v11 = vadd.f32 0.014752088, %v867_v3  ;;  %v768_v5 = vsel %vm1485_vm2, %v767_v8, %v763_v1  ;;  %v821_v32 = vadd.f32 0.18741608, %v820_v23  ;;  %v895_v18 = vadd.f32 0.00028619796, %v894_v6 }
 0x11f   : > { %v1541_v17 = vadd.f32 1.0, %v833_v33  ;;  %v803_v20 = vsel %vm802_vm9, %v1141_v36, %v799_v10  ;;  %v858_v22 = vmul.f32 %v857_v60, %v1425_v14  ;;  %v906_v25 = vadd.f32 0.001143296, %v905_v13 }
 0x120   : > { %v869_v16 = vmul.f32 %v868_v11, %v1425_v14  ;;  %v729_v26 = vmul.f32 %v728_v7, %v1438_v48  ;;  %v808_v4 = vsel %vm1513_vm6, %v807_v43, %v803_v20  ;;  %v769_v61 = vmul.f32 %v768_v5, %v1451_v59 }
 0x121   : > { %1142 = vrcp.f32 %v1541_v17  ;;  %v809_v8 = vmul.f32 %v808_v4, %v784_v30  ;;  %v822_v57 = vmul.f32 %v821_v32, %v1412_v55  ;;  %v896_v31 = vmul.f32 %v895_v18, %v1501_v54 }
 0x122   : > { %v870_v28 = vadd.f32 0.112945676, %v869_v16  ;;  %v907_v58 = vmul.f32 %v906_v25, %v1501_v54  ;;  %v638_v34 = vmul.f32 0.5, %v1311_v40  ;;  %v1088_v36 = vclamps-f32 %v689_v46, 1.0 }
 0x123   : > { %v859_v19 = vadd.f32 0.05243302, %v858_v22  ;;  %v639_v48 = vmul.f32 0.5, %v1314_v21  ;;  %v1089_v12 = vclamps-f32 %v729_v26, 1.0  ;;  %v640_v59 = vmul.f32 0.5, %v1317_v41 }
 0x124   : > { %v871_v37 = vmul.f32 %v870_v28, %v1425_v14  ;;  %v908_v49 = vadd.f32 0.014752088, %v907_v58  ;;  %v641_v30 = vmul.f32 0.5, %v1320_v42  ;;  %v1090_v55 = vclamps-f32 %v769_v61, 1.0 }
 0x125   : > { %v1091_v50 = vclamps-f32 %v809_v8, 1.0  ;;  %v823_v51 = vadd.f32 1.1283791, %v822_v57  ;;  %v897_v53 = vadd.f32 0.0036580483, %v896_v31  ;;  %v860_v56 = vmul.f32 %v859_v19, %v1425_v14 }
 0x126   : > { %v872_v52 = vadd.f32 0.4994258, %v871_v37  ;;  %v909_v40 = vmul.f32 %v908_v49, %v1501_v54  ;;  %v844_v21 = vand.u32 2147483647, %v1541_v17  ;;  %v932_v45 = vadd.f32 1.0, %v1088_v36 }
 0x127   : > { %v1143_v47 = vpop.eup %1142  ;;  %v846_v41 = vand.u32 2147483648, %v1541_v17  ;;  %v933_v63 = vadd.f32 1.0, %v1089_v12  ;;  %v934_v35 = vadd.f32 1.0, %v1090_v55  ;;  %v935_v23 = vadd.f32 1.0, %v1091_v50 }
 0x128   : > { %v836_v39 = vmul.f32 %v1143_v47, %v1541_v17  ;;  %v873_v42 = vmul.f32 %v872_v52, %v1425_v14  ;;  %v910_v62 = vadd.f32 0.112945676, %v909_v40  ;;  %v939_v0 = vmul.f32 %v932_v45, %v638_v34 }
 0x129   : > { %v898_v2 = vmul.f32 %v897_v53, %v1501_v54  ;;  %v940_v3 = vmul.f32 %v933_v63, %v639_v48  ;;  %vm841_vm10 = vweird.f32 %v1143_v47  ;;  %v941_v43 = vmul.f32 %v934_v35, %v640_v59 }
 0x12a   : > { %v837_v38 = vsub.f32 1.0, %v836_v39  ;;  %v874_v1 = vadd.f32 1.0, %v873_v42  ;;  %v911_v60 = vmul.f32 %v910_v62, %v1501_v54  ;;  %v942_v33 = vmul.f32 %v935_v23, %v641_v30 }
 0x12b   : > { %v824_v6 = vmul.f32 %v823_v51, %v1350_v29  ;;  %vm840_vm11 = vweird.f32 %v1541_v17  ;;  %v946_v7 = vpack.c.bf16 %v939_v0, %v939_v0  ;;  %v861_v11 = vadd.f32 0.18741608, %v860_v56 }
 0x12c   : > { %v838_v46 = vmul.f32 %v1143_v47, %v837_v38  ;;  %1144 = vrcp.f32 %v874_v1  ;;  %v912_v13 = vadd.f32 0.4994258, %v911_v60  ;;  %v947_v5 = vpack.c.bf16 %v940_v3, %v940_v3  ;;  %vm842_vm12 = vmor %vm840_vm11, %vm841_vm10 }
 0x12d   : > { %vm845_vm13 = vcmp.eq.f32.partialorder %v844_v21, 8.507059e+37  ;;  %v847_v32 = vor.u32 1.1754944e-38, %v846_v41  ;;  %v899_v29 = vadd.f32 0.05243302, %v898_v2  ;;  %v948_v18 = vpack.c.bf16 %v941_v43, %v941_v43 }
 0x12e   : > { %v839_v10 = vadd.f32 %v1143_v47, %v838_v46  ;;  %v913_v20 = vmul.f32 %v912_v13, %v1501_v54  ;;  %v949_v22 = vpack.c.bf16 %v942_v33, %v942_v33  ;;  %vm953_vm14 = vcmask 125952  }
 0x12f   : > { %954 = vst.msk [vmem:[%s1572_s18] sm:$0xf] %vm953_vm14, %v946_v7  ;;  %v862_v61 = vmul.f32 %v861_v11, %v1425_v14  ;;  %v900_v8 = vmul.f32 %v899_v29, %v1501_v54  ;;  %v642_v31 = vmul.f32 0.5, %v1326_v44  ;;  %v886_v19 = vand.u32 2147483648, %v874_v1 }
 0x130   : > { %v843_v17 = vsel %vm842_vm12, %v1143_v47, %v839_v10  ;;  %v914_v26 = vadd.f32 1.0, %v913_v20  ;;  %955 = vst.msk [vmem:[%s1572_s18 + $0x4] sm:$0xf] %vm953_vm14, %v947_v5  ;;  %v884_v14 = vand.u32 2147483647, %v874_v1  ;;  %vm880_vm0 = vweird.f32 %v874_v1 }
 0x131   : > { %v848_v16 = vsel %vm845_vm13, %v847_v32, %v843_v17  ;;  %956 = vst.msk [vmem:[%s1572_s18 + $0x8] sm:$0xf] %vm953_vm14, %v948_v18  ;;  %v863_v36 = vadd.f32 1.1283791, %v862_v61  ;;  %v901_v48 = vadd.f32 0.18741608, %v900_v8 }
 0x132   : > { %v849_v25 = vmul.f32 %v848_v16, %v824_v6  ;;  %v1145_v4 = vpop.eup %1144  ;;  %957 = vst.msk [vmem:[%s1572_s18 + $0xc] sm:$0xf] %vm953_vm14, %v949_v22  ;;  %1146 = vrcp.f32 %v914_v26  ;;  %v887_v55 = vor.u32 1.1754944e-38, %v886_v19  ;;  %vm885_vm2 = vcmp.eq.f32.partialorder %v884_v14, 8.507059e+37 }
 0x133   : > { %v876_v28 = vmul.f32 %v1145_v4, %v874_v1  ;;  %vm881_vm15 = vweird.f32 %v1145_v4  ;;  %v902_v50 = vmul.f32 %v901_v48, %v1501_v54  ;;  %v864_v44 = vmul.f32 %v863_v36, %v1392_v9 }
 0x134   : > { %v1092_v57 = vclamps-f32 %v849_v25, 1.0  ;;  %vm882_vm1 = vmor %vm880_vm0, %vm881_vm15  ;;  %v926_v21 = vand.u32 2147483648, %v914_v26  ;;  %v924_v41 = vand.u32 2147483647, %v914_v26  ;;  %v643_v42 = vmul.f32 0.5, %v1373_v24 }
 0x135   : > { %v877_v58 = vsub.f32 1.0, %v876_v28  ;;  %v903_v39 = vadd.f32 1.1283791, %v902_v50  ;;  %vm920_vm4 = vweird.f32 %v914_v26  ;;  %v644_v60 = vmul.f32 0.5, %v1398_v15 }
 0x136   : > { %v936_v34 = vadd.f32 1.0, %v1092_v57  ;;  %v927_v62 = vor.u32 1.1754944e-38, %v926_v21  ;;  %vm925_vm6 = vcmp.eq.f32.partialorder %v924_v41, 8.507059e+37 }
 0x137   : > { %v878_v12 = vmul.f32 %v1145_v4, %v877_v58  ;;  %v904_v63 = vmul.f32 %v903_v39, %v1417_v27 }
 0x138   : > { %v943_v37 = vmul.f32 %v936_v34, %v642_v31  ;;  %v1147_v30 = vpop.eup %1146 }
 0x139   : > { %v879_v49 = vadd.f32 %v1145_v4, %v878_v12  ;;  %v916_v51 = vmul.f32 %v1147_v30, %v914_v26  ;;  %vm921_vm3 = vweird.f32 %v1147_v30 }
 0x13a   : > { %v950_v59 = vpack.c.bf16 %v943_v37, %v943_v37  ;;  %vm922_vm5 = vmor %vm920_vm4, %vm921_vm3 }
 0x13b   : > { %v883_v47 = vsel %vm882_vm1, %v1145_v4, %v879_v49  ;;  %v917_v40 = vsub.f32 1.0, %v916_v51 }
 0x13c   : > { %958 = vst.msk [vmem:[%s1572_s18 + $0x10] sm:$0xf] %vm953_vm14, %v950_v59  ;;  %v888_v52 = vsel %vm885_vm2, %v887_v55, %v883_v47 }
 0x13d   : > { %v889_v53 = vmul.f32 %v888_v52, %v864_v44  ;;  %v918_v45 = vmul.f32 %v1147_v30, %v917_v40 }
 0x13f   : > { %v1093_v56 = vclamps-f32 %v889_v53, 1.0  ;;  %v919_v54 = vadd.f32 %v1147_v30, %v918_v45 }
 0x141   : > { %v937_v9 = vadd.f32 1.0, %v1093_v56  ;;  %v923_v38 = vsel %vm922_vm5, %v1147_v30, %v919_v54 }
 0x142   : > { %v928_v23 = vsel %vm925_vm6, %v927_v62, %v923_v38 }
 0x143   : > { %v944_v35 = vmul.f32 %v937_v9, %v643_v42  ;;  %v929_v0 = vmul.f32 %v928_v23, %v904_v63 }
 0x145   : > { %v951_v1 = vpack.c.bf16 %v944_v35, %v944_v35  ;;  %v1094_v2 = vclamps-f32 %v929_v0, 1.0 }
 0x147   : > { %959 = vst.msk [vmem:[%s1572_s18 + $0x14] sm:$0xf] %vm953_vm14, %v951_v1  ;;  %v938_v24 = vadd.f32 1.0, %v1094_v2 }
 0x149   : > { %v945_v3 = vmul.f32 %v938_v24, %v644_v60 }
 0x14b   : > { %v952_v46 = vpack.c.bf16 %v945_v3, %v945_v3 }
 0x14d   : > { %960 = vst.msk [vmem:[%s1572_s18 + $0x18] sm:$0xf] %vm953_vm14, %v952_v46 }
 0x14e PF: > { %s15_s20 = sadd.s32 1, %s1170_s20   ;;  %s1626_s18 = smov %s1166_s19 }
 0x14f   : > { %p12_p5 = scmp.ge.s32.totalorder %s15_s20, 4   ;;  %s1627_s19 = smov %s1629_s21 }
 0x151   :  { %14 = sbr.rel (!%p12_p5) target bundleno = 2 (0x2), region = 73 }

</bundles_post_ra>
